<compile_context>
chip_gen: v5e
topology: v5e:2x2
jax: 0.10.0
libtpu: 0.0.40
codegen_flags: <defaults>
</compile_context>

<pallas_src>
import functools
import math

import jax
import jax.numpy as jnp
from jax.experimental import pallas as pl
from jax.experimental.pallas import tpu as pltpu

GROUPS = 4  # GResidualBlock uses groups=4 for the 3x3 conv


# ---------------------------------------------------------------------------
# Kernel: one batch element per grid step, fully fused residual block.
# ---------------------------------------------------------------------------
def _gres_kernel(xp_ref, w1_ref, b1_ref, w2_ref, b2_ref, o_ref, *, H, W, C):
    # xp_ref: (1, H+2, W+2, C) padded input block
    # w1_ref: (9*C, C)   block-diagonal (grouped) 3x3 conv weight, tap-major
    # w2_ref: (C, C)     1x1 conv weight (Cin, Cout)
    # b1/b2 : (1, C)
    # o_ref : (1, H*W, C)
    xp = xp_ref[0]  # (H+2, W+2, C), already resident in VMEM

    # Build the 9 shifted 3x3 taps in VMEM (no HBM im2col), flattened to rows.
    taps = [xp[dy:dy + H, dx:dx + W, :].reshape(H * W, C)
            for dy in range(3) for dx in range(3)]
    t = jnp.concatenate(taps, axis=-1)                      # (H*W, 9*C)

    # conv1 (grouped 3x3) as a single K=9C MXU matmul, f32 accumulate.
    h = jnp.dot(t, w1_ref[...], preferred_element_type=jnp.float32)
    h = jnp.maximum(h + b1_ref[...], 0.0)                   # bias + ReLU

    # conv2 (1x1) + residual (center tap == x) + final ReLU.
    y = jnp.dot(h, w2_ref[...], preferred_element_type=jnp.float32)
    y = y + b2_ref[...] + taps[4]                           # bias + skip connection
    o_ref[0] = jnp.maximum(y, 0.0)


# ---------------------------------------------------------------------------
# Wrapper glue (plain JAX): layout conversion, padding, weight folding.
# ---------------------------------------------------------------------------
def _grouped3x3_to_flat(w_g, groups):
    """PyTorch grouped weight (Cout, Cin/groups, 3, 3) -> dense (9*Cin, Cout).

    Block-diagonal across groups (mathematically identical to the grouped conv),
    tap-major row ordering: row k*Cin + cin with k = dy*3 + dx.
    """
    Cout, Cin_g, KH, KW = w_g.shape
    Cin = Cin_g * groups
    Cout_g = Cout // groups
    dense = jnp.zeros((KH, KW, Cin, Cout), w_g.dtype)
    for g in range(groups):
        blk = jnp.transpose(w_g[g * Cout_g:(g + 1) * Cout_g], (2, 3, 1, 0))
        dense = dense.at[:, :,
                         g * Cin_g:(g + 1) * Cin_g,
                         g * Cout_g:(g + 1) * Cout_g].set(blk)
    return dense.reshape(KH * KW * Cin, Cout)


@functools.partial(jax.jit, static_argnums=(2,))
def g_residual_block(x_nchw, params, groups=GROUPS):
    """Forward pass of GResidualBlock. Input/output are NCHW like PyTorch."""
    x = jnp.transpose(x_nchw, (0, 2, 3, 1)).astype(jnp.float32)   # NCHW -> NHWC
    N, H, W, C = x.shape
    xp = jnp.pad(x, ((0, 0), (1, 1), (1, 1), (0, 0)))             # SAME padding

    w1 = _grouped3x3_to_flat(params["w1"], groups)                # (9C, C)
    w2 = jnp.transpose(params["w2"][:, :, 0, 0], (1, 0))          # (Cin, Cout)
    b1 = params["b1"].reshape(1, C)
    b2 = params["b2"].reshape(1, C)

    kernel = functools.partial(_gres_kernel, H=H, W=W, C=C)
    out = pl.pallas_call(
        kernel,
        out_shape=jax.ShapeDtypeStruct((N, H * W, C), jnp.float32),
        grid=(N,),
        in_specs=[
            pl.BlockSpec((1, H + 2, W + 2, C), lambda n: (n, 0, 0, 0)),
            pl.BlockSpec((9 * C, C), lambda n: (0, 0)),
            pl.BlockSpec((1, C), lambda n: (0, 0)),
            pl.BlockSpec((C, C), lambda n: (0, 0)),
            pl.BlockSpec((1, C), lambda n: (0, 0)),
        ],
        out_specs=pl.BlockSpec((1, H * W, C), lambda n: (n, 0, 0)),
        compiler_params=pltpu.CompilerParams(
            dimension_semantics=("parallel",),
            vmem_limit_bytes=32 * 1024 * 1024,
        ),
    )(xp, w1, b1, w2, b2)

    out = out.reshape(N, H, W, C)
    return jnp.transpose(out, (0, 3, 1, 2))                       # NHWC -> NCHW


# ---------------------------------------------------------------------------
# Pure-JAX reference mirroring the PyTorch module (independent code path).
# ---------------------------------------------------------------------------
def reference(x_nchw, params, groups=GROUPS):
    x = jnp.transpose(x_nchw, (0, 2, 3, 1))
    rhs1 = jnp.transpose(params["w1"], (2, 3, 1, 0))   # (3,3,Cin/g,Cout)
    h = jax.lax.conv_general_dilated(
        x, rhs1, (1, 1), "SAME",
        dimension_numbers=("NHWC", "HWIO", "NHWC"),
        feature_group_count=groups)
    h = jax.nn.relu(h + params["b1"].reshape(1, 1, 1, -1))
    rhs2 = jnp.transpose(params["w2"], (2, 3, 1, 0))   # (1,1,Cin,Cout)
    y = jax.lax.conv_general_dilated(
        h, rhs2, (1, 1), "VALID",
        dimension_numbers=("NHWC", "HWIO", "NHWC"))
    y = jax.nn.relu(y + params["b2"].reshape(1, 1, 1, -1) + x)
    return jnp.transpose(y, (0, 3, 1, 2))


def make_params(key, C, groups=GROUPS):
    ks = jax.random.split(key, 4)
    cin_g = C // groups
    bnd1 = 1.0 / math.sqrt(cin_g * 9)   # ~PyTorch Conv2d default scale
    bnd2 = 1.0 / math.sqrt(C)
    return {
        "w1": jax.random.uniform(ks[0], (C, cin_g, 3, 3), jnp.float32, -bnd1, bnd1),
        "b1": jax.random.uniform(ks[1], (C,), jnp.float32, -bnd1, bnd1),
        "w2": jax.random.uniform(ks[2], (C, C, 1, 1), jnp.float32, -bnd2, bnd2),
        "b2": jax.random.uniform(ks[3], (C,), jnp.float32, -bnd2, bnd2),
    }


if __name__ == "__main__":
    key = jax.random.PRNGKey(0)
    k_x, k_p = jax.random.split(key)

    # Small shapes consistent with the module: batch=2, channels=64 (divisible by
    # groups=4, residual needs in==out channels), spatial 16x16.
    N, C, H, W = 2, 64, 16, 16
    x = jax.random.normal(k_x, (N, C, H, W), jnp.float32)   # NCHW like PyTorch
    params = make_params(k_p, C)

    out = jax.block_until_ready(g_residual_block(x, params))
    ref = jax.block_until_ready(reference(x, params))

    assert out.shape == x.shape and out.dtype == jnp.float32
    max_err = float(jnp.max(jnp.abs(out - ref)))
    assert jnp.allclose(out, ref, rtol=1e-3, atol=1e-3), max_err

    print("KERNEL_OK")
</pallas_src>

<mosaic_0001>
module attributes {stable_mosaic.version = 11 : i64} {
  func.func @_gres_kernel(%arg0: i32, %arg1: memref<1x18x18x64xf32, #tpu.memory_space<vmem>>, %arg2: memref<576x64xf32, #tpu.memory_space<vmem>>, %arg3: memref<1x64xf32, #tpu.memory_space<vmem>>, %arg4: memref<64x64xf32, #tpu.memory_space<vmem>>, %arg5: memref<1x64xf32, #tpu.memory_space<vmem>>, %arg6: memref<1x256x64xf32, #tpu.memory_space<vmem>>) attributes {dimension_semantics = [#tpu.dimension_semantics<parallel>], iteration_bounds = array<i64: 2>, scalar_prefetch = 0 : i64, scratch_operands = 0 : i64, tpu.core_type = #tpu.core_type<tc>, window_params = [{transform_indices = @transform_0, window_bounds = array<i64: 1, 18, 18, 64>}, {pipeline_mode = #tpu.pipeline_mode<synchronous>, transform_indices = @transform_1, window_bounds = array<i64: 576, 64>}, {pipeline_mode = #tpu.pipeline_mode<synchronous>, transform_indices = @transform_2, window_bounds = array<i64: 1, 64>}, {pipeline_mode = #tpu.pipeline_mode<synchronous>, transform_indices = @transform_3, window_bounds = array<i64: 64, 64>}, {pipeline_mode = #tpu.pipeline_mode<synchronous>, transform_indices = @transform_4, window_bounds = array<i64: 1, 64>}, {transform_indices = @transform_5, window_bounds = array<i64: 1, 256, 64>}]} {
    %c0 = arith.constant 0 : index
    %c0_0 = arith.constant 0 : index
    %c0_1 = arith.constant 0 : index
    %c0_2 = arith.constant 0 : index
    %0 = vector.load %arg1[%c0, %c0_0, %c0_1, %c0_2] : memref<1x18x18x64xf32, #tpu.memory_space<vmem>>, vector<1x18x18x64xf32>
    %1 = vector.shape_cast %0 : vector<1x18x18x64xf32> to vector<18x18x64xf32>
    %2 = vector.extract_strided_slice %1 {offsets = [0, 0, 0], sizes = [16, 16, 64], strides = [1, 1, 1]} : vector<18x18x64xf32> to vector<16x16x64xf32>
    %3 = vector.shape_cast %2 : vector<16x16x64xf32> to vector<256x64xf32>
    %4 = vector.extract_strided_slice %1 {offsets = [0, 1, 0], sizes = [16, 16, 64], strides = [1, 1, 1]} : vector<18x18x64xf32> to vector<16x16x64xf32>
    %5 = vector.shape_cast %4 : vector<16x16x64xf32> to vector<256x64xf32>
    %6 = vector.extract_strided_slice %1 {offsets = [0, 2, 0], sizes = [16, 16, 64], strides = [1, 1, 1]} : vector<18x18x64xf32> to vector<16x16x64xf32>
    %7 = vector.shape_cast %6 : vector<16x16x64xf32> to vector<256x64xf32>
    %8 = vector.extract_strided_slice %1 {offsets = [1, 0, 0], sizes = [16, 16, 64], strides = [1, 1, 1]} : vector<18x18x64xf32> to vector<16x16x64xf32>
    %9 = vector.shape_cast %8 : vector<16x16x64xf32> to vector<256x64xf32>
    %10 = vector.extract_strided_slice %1 {offsets = [1, 1, 0], sizes = [16, 16, 64], strides = [1, 1, 1]} : vector<18x18x64xf32> to vector<16x16x64xf32>
    %11 = vector.shape_cast %10 : vector<16x16x64xf32> to vector<256x64xf32>
    %12 = vector.extract_strided_slice %1 {offsets = [1, 2, 0], sizes = [16, 16, 64], strides = [1, 1, 1]} : vector<18x18x64xf32> to vector<16x16x64xf32>
    %13 = vector.shape_cast %12 : vector<16x16x64xf32> to vector<256x64xf32>
    %14 = vector.extract_strided_slice %1 {offsets = [2, 0, 0], sizes = [16, 16, 64], strides = [1, 1, 1]} : vector<18x18x64xf32> to vector<16x16x64xf32>
    %15 = vector.shape_cast %14 : vector<16x16x64xf32> to vector<256x64xf32>
    %16 = vector.extract_strided_slice %1 {offsets = [2, 1, 0], sizes = [16, 16, 64], strides = [1, 1, 1]} : vector<18x18x64xf32> to vector<16x16x64xf32>
    %17 = vector.shape_cast %16 : vector<16x16x64xf32> to vector<256x64xf32>
    %18 = vector.extract_strided_slice %1 {offsets = [2, 2, 0], sizes = [16, 16, 64], strides = [1, 1, 1]} : vector<18x18x64xf32> to vector<16x16x64xf32>
    %19 = vector.shape_cast %18 : vector<16x16x64xf32> to vector<256x64xf32>
    %20 = tpu.concatenate %3, %5, %7, %9, %11, %13, %15, %17, %19 in 1 : vector<256x64xf32>, vector<256x64xf32>, vector<256x64xf32>, vector<256x64xf32>, vector<256x64xf32>, vector<256x64xf32>, vector<256x64xf32>, vector<256x64xf32>, vector<256x64xf32> -> vector<256x576xf32>
    %c0_3 = arith.constant 0 : index
    %c0_4 = arith.constant 0 : index
    %21 = vector.load %arg2[%c0_3, %c0_4] : memref<576x64xf32, #tpu.memory_space<vmem>>, vector<576x64xf32>
    %cst = arith.constant dense<0.000000e+00> : vector<256x64xf32>
    %22 = tpu.matmul %20, %21, %cst {dimension_numbers = #tpu.dot_dimension_numbers<[1], [0], [0], [1], [0, 0, 1, 1], [], []>} : vector<256x576xf32>, vector<576x64xf32>, vector<256x64xf32> -> vector<256x64xf32>
    %c0_5 = arith.constant 0 : index
    %c0_6 = arith.constant 0 : index
    %23 = vector.load %arg3[%c0_5, %c0_6] : memref<1x64xf32, #tpu.memory_space<vmem>>, vector<1x64xf32>
    %24 = vector.broadcast %23 : vector<1x64xf32> to vector<256x64xf32>
    %25 = arith.addf %22, %24 : vector<256x64xf32>
    %cst_7 = arith.constant 0.000000e+00 : f32
    %26 = vector.broadcast %cst_7 : f32 to vector<256x64xf32>
    %27 = arith.maximumf %25, %26 : vector<256x64xf32>
    %c0_8 = arith.constant 0 : index
    %c0_9 = arith.constant 0 : index
    %28 = vector.load %arg4[%c0_8, %c0_9] : memref<64x64xf32, #tpu.memory_space<vmem>>, vector<64x64xf32>
    %cst_10 = arith.constant dense<0.000000e+00> : vector<256x64xf32>
    %29 = tpu.matmul %27, %28, %cst_10 {dimension_numbers = #tpu.dot_dimension_numbers<[1], [0], [0], [1], [0, 0, 1, 1], [], []>} : vector<256x64xf32>, vector<64x64xf32>, vector<256x64xf32> -> vector<256x64xf32>
    %c0_11 = arith.constant 0 : index
    %c0_12 = arith.constant 0 : index
    %30 = vector.load %arg5[%c0_11, %c0_12] : memref<1x64xf32, #tpu.memory_space<vmem>>, vector<1x64xf32>
    %31 = vector.broadcast %30 : vector<1x64xf32> to vector<256x64xf32>
    %32 = arith.addf %29, %31 : vector<256x64xf32>
    %33 = arith.addf %32, %11 : vector<256x64xf32>
    %cst_13 = arith.constant 0.000000e+00 : f32
    %34 = vector.broadcast %cst_13 : f32 to vector<256x64xf32>
    %35 = arith.maximumf %33, %34 : vector<256x64xf32>
    %c0_14 = arith.constant 0 : index
    %c0_15 = arith.constant 0 : index
    %c0_16 = arith.constant 0 : index
    %36 = vector.load %arg6[%c0_14, %c0_15, %c0_16] : memref<1x256x64xf32, #tpu.memory_space<vmem>>, vector<1x256x64xf32>
    %37 = vector.shape_cast %36 : vector<1x256x64xf32> to vector<256x64xf32>
    %38 = vector.shape_cast %35 : vector<256x64xf32> to vector<1x256x64xf32>
    tpu.vector_store %arg6[%c0_14, %c0_15, %c0_16], %38 {strides = array<i32>} : memref<1x256x64xf32, #tpu.memory_space<vmem>>, vector<1x256x64xf32>,
    return
  }
  func.func @transform_0(%arg0: i32) -> (i32, i32, i32, i32) {
    %c0_i32 = arith.constant 0 : i32
    %c0_i32_0 = arith.constant 0 : i32
    %c0_i32_1 = arith.constant 0 : i32
    %c0_i32_2 = arith.constant 0 : i32
    return %arg0, %c0_i32, %c0_i32_0, %c0_i32_1 : i32, i32, i32, i32
  }
  func.func @transform_1(%arg0: i32) -> (i32, i32) {
    %c0_i32 = arith.constant 0 : i32
    %c0_i32_0 = arith.constant 0 : i32
    %c0_i32_1 = arith.constant 0 : i32
    return %c0_i32, %c0_i32_0 : i32, i32
  }
  func.func @transform_2(%arg0: i32) -> (i32, i32) {
    %c0_i32 = arith.constant 0 : i32
    %c0_i32_0 = arith.constant 0 : i32
    %c0_i32_1 = arith.constant 0 : i32
    return %c0_i32, %c0_i32_0 : i32, i32
  }
  func.func @transform_3(%arg0: i32) -> (i32, i32) {
    %c0_i32 = arith.constant 0 : i32
    %c0_i32_0 = arith.constant 0 : i32
    %c0_i32_1 = arith.constant 0 : i32
    return %c0_i32, %c0_i32_0 : i32, i32
  }
  func.func @transform_4(%arg0: i32) -> (i32, i32) {
    %c0_i32 = arith.constant 0 : i32
    %c0_i32_0 = arith.constant 0 : i32
    %c0_i32_1 = arith.constant 0 : i32
    return %c0_i32, %c0_i32_0 : i32, i32
  }
  func.func @transform_5(%arg0: i32) -> (i32, i32, i32) {
    %c0_i32 = arith.constant 0 : i32
    %c0_i32_0 = arith.constant 0 : i32
    %c0_i32_1 = arith.constant 0 : i32
    return %arg0, %c0_i32, %c0_i32_0 : i32, i32, i32
  }
}

</mosaic_0001>

<bundles_post_ra>
// kernel: g_residual_block.1
= control target key start
LH: loop header
LB: loop body
LE: loop exit
PB: predicated region body
PF: predicated region fallthrough
CT: control target
= control target key end

     0   :  { %10 = vsyncpa [#allocation3], 0  ;;  %s4285_s0 = inlined_call_operand.vmem [shape: f32[2,18,18,64], index: 0, kind: input, shape index: {}]   ;;  %s4286_s1 = inlined_call_operand.vmem [shape: f32[576,64], index: 1, kind: input, shape index: {}]   ;;  %s4287_s2 = inlined_call_operand.vmem [shape: f32[1,64], index: 2, kind: input, shape index: {}]   ;;  %s4288_s3 = inlined_call_operand.vmem [shape: f32[64,64], index: 3, kind: input, shape index: {}]   ;;  %s4289_s4 = inlined_call_operand.vmem [shape: f32[1,64], index: 4, kind: input, shape index: {}]   ;;  %s4290_s5 = inlined_call_operand.hbm [shape: f32[2,256,64], index: 5, kind: output, shape index: {}]  }
   0x1   :  { %12 = vsyncpa [#allocation3 + $0x1], 0  ;;  %s2516_s18 = smov 0   ;;  %s2518_s19 = smov 0  }
   0x2   :  { %s2520_s20 = smov 0   ;;  %s2522_s21 = smov 0  }
   0x3 LB: > { %s2537_s22 = sadd.s32 4294967295, %s2481_s21   ;;  %s2110_s23 = sadd.s32 4294967294, %s2481_s21   ;;  %s2481_s21 = sphi %s2522_s21, %s4517_s21   ;;  %s2477_s20 = sphi %s2520_s20, %s4516_s20   ;;  %s2473_s19 = sphi %s2518_s19, %s4515_s19   ;;  %s2469_s18 = sphi %s2516_s18, %s4514_s18  }
   0x4   : > { %s2541_s24 = sadd.s32 1, %s2481_s21   ;;  %s135_s25 = sadd.s32 1, %s2477_s20 }
   0x5   : > { %s132_s26 = ssub.s32 %s2481_s21, %s2541_s24  ;;  %p145_p0 = scmp.ne.s32.totalorder %s2477_s20, %s2473_s19 }
   0x6   : > { %p133_p1 = scmp.eq.s32.totalorder %s132_s26, 0  ;;  %p146_p2 = scmp.eq.s32.totalorder %s2537_s22, 1 }
   0x7   : > { %p151_p3 = scmp.ne.s32.totalorder %s2473_s19, %s2469_s18  ;;  %p152_p4 = scmp.eq.s32.totalorder %s2110_s23, 1 }
   0x8   : > { %s2552_s27 = scalar_select %p133_p1, %s2477_s20, %s135_s25  }
   0x9   : > { %p2554_p5 = por %p146_p2, %p145_p0  ;;  %p2558_p6 = por %p152_p4, %p151_p3 }
   0xa   : > { %p2113_p7 = scmp.ge.s32.totalorder %s2481_s21, 1  ;;  %p190_p8 = scmp.lt.s32.totalorder %s2481_s21, 3 }
   0xc   : > { %p191_p9 = pnand %p2113_p7, %p190_p8 }
   0xe   : > { %194 = sbr.rel (%p191_p9) target bundleno = 803 (0x323), region = 40 }
  0x13   : > { %p218_p10 = scmp.lt.s32.totalorder %s2537_s22, 1  ;;  %vm325_vm0 = vcmask 1046528   ;;  %s2483_s10 = smov 64   ;;  %vm406_vm1 = vcmask 1045504   ;;  %vm877_vm2 = vcmask 523264  }
  0x14   : > { %s215_s25 = sand.u32 1, %s2473_s19   ;;  %s2439_s23 = scalar_lea.hbm %s4290_s5, 512 }
  0x15   : > { %s219_s30 = scalar_select %p218_p10, %s2537_s22, 1 }
  0x16   : > { %s2114_s26 = sshll.u32 %s215_s25, 8 }
  0x17   : > { %s2218_s6 = smul.u32 432, %s219_s30  ;;  %s4094_s30 = scalar_lea.vmem [#allocation2], %s2114_s26 }
  0x18   : > { %s2045_s12 = sshll.u32 %s4094_s30, 4  ;;  %s2046_s12 = int_to_ptr.vmem [resolvable:$true] %s2045_s12 }
  0x19   : > { %s2569_s9 = scalar_lea.vmem %s4285_s0, %s2218_s6  ;;  %s2185_s6 = sshll.u32 %s2537_s22, 8 }
  0x1a   : > { %v2572_v0 = vld [vmem:[%s2569_s9 + $0xd8] sm:$0xff]  ;;  %v2575_v1 = vld [vmem:[%s2569_s9 + $0xe0] sm:$0xff]  ;;  %v2583_v5 = vld [vmem:[%s2569_s9 + $0xc8] sm:$0xff]  ;;  %s2044_s11 = scalar_lea.hbm %s4290_s5, %s2185_s6  ;;  %s2033_s22 = scalar_lea.sflag [#allocation3], %s215_s25 }
  0x1b   : > { %v2578_v2 = vld [vmem:[%s2569_s9 + $0xc0] sm:$0xff]  ;;  %v371_v3 = vrot.slane %v2572_v0, 1  ;;  %v372_v4 = vrot.slane %v2575_v1, 1  ;;  %v2587_v7 = vld [vmem:[%s2569_s9 + $0x8] sm:$0xff]  ;;  %v367_v8 = vrot.slane %v2583_v5, 1  ;;  %v2612_v20 = vld [vmem:[%s2569_s9 + $0xf0] sm:$0xff] }
  0x1c   : > { %v366_v6 = vrot.slane %v2578_v2, 1  ;;  %v225_v9 = vld [vmem:[%s2569_s9 + $0x10] sm:$0x3]  ;;  %v2592_v10 = vld [vmem:[%s2569_s9] sm:$0xff]  ;;  %v327_v12 = vrot.slane %v2587_v7, 1  ;;  %v2620_v23 = vld [vmem:[%s2569_s9 + $0x38] sm:$0xff] }
  0x1d   : > { %v2595_v11 = vsel %vm325_vm0, %v371_v3, %v372_v4  ;;  %v329_v13 = vrot.slane %v225_v9, 1  ;;  %v2599_v14 = vld [vmem:[%s2569_s9 + $0xd0] sm:$0x3]  ;;  %v326_v17 = vrot.slane %v2592_v10, 1  ;;  %v2623_v24 = vld [vmem:[%s2569_s9 + $0x20] sm:$0xff]  ;;  %v2626_v25 = vld [vmem:[%s2569_s9 + $0x18] sm:$0xff] }
  0x1e   : > { %4378 = vst [vmem:[#allocation5_spill] sm:$0xff] %v2595_v11  ;;  %v2271_v15 = vpack.i.bf16 %v2595_v11, %v2575_v1  ;;  %v2604_v16 = vsel %vm325_vm0, %v366_v6, %v367_v8  ;;  %v369_v18 = vrot.slane %v2599_v14, 1  ;;  %v2615_v21 = vld [vmem:[%s2569_s9 + $0x30] sm:$0xff]  ;;  %v2633_v28 = vld [vmem:[%s2569_s9 + $0xf8] sm:$0xff]  ;;  %v2636_v29 = vld [vmem:[%s2569_s9 + $0x100] sm:$0x3] }
  0x1f   : > { %4379 = vst [vmem:[#allocation6_spill] sm:$0xff] %v2604_v16  ;;  %v2261_v19 = vpack.i.bf16 %v2572_v0, %v2604_v16  ;;  %v330_v22 = vsel %vm325_vm0, %v327_v12, %v329_v13  ;;  %v328_v26 = vsel %vm325_vm0, %v326_v17, %v327_v12  ;;  %v2639_v30 = vld [vmem:[%s2569_s9 + $0xe8] sm:$0x3]  ;;  %v336_v31 = vrot.slane %v2615_v21, 1  ;;  %v2675_v49 = vld [vmem:[%s2569_s9 + $0x50] sm:$0xff]  ;;  %v2724_v12 = vld [vmem:[%s2569_s9 + $0x120] sm:$0xff] }
  0x20   : > { %2272 = vrot.lane.b32.xlu1 %v2271_v15, %s2483_s10  ;;  %v2630_v27 = vsel %vm325_vm0, %v367_v8, %v369_v18  ;;  %v2643_v32 = vld [vmem:[%s2569_s9 + $0x28] sm:$0x3]  ;;  %v2276_v33 = vpack.i.bf16 %v2612_v20, %v330_v22  ;;  %v332_v34 = vrot.slane %v2623_v24, 1  ;;  %v331_v35 = vrot.slane %v2626_v25, 1  ;;  %v2685_v52 = vld [vmem:[%s2569_s9 + $0x110] sm:$0xff]  ;;  %v2717_v8 = vld [vmem:[%s2569_s9 + $0x60] sm:$0xff] }
  0x21   : > { %2262 = vrot.lane.b32.xlu0 %v2261_v19, %s2483_s10  ;;  %4380 = vst [vmem:[#allocation7_spill] sm:$0xff] %v2630_v27  ;;  %v374_v36 = vrot.slane %v2639_v30, 1  ;;  %v2266_v37 = vpack.i.bf16 %v328_v26, %v2630_v27  ;;  %v337_v38 = vrot.slane %v2620_v23, 1  ;;  %v377_v39 = vrot.slane %v2633_v28, 1  ;;  %v2672_v48 = vld [vmem:[%s2569_s9 + $0x48] sm:$0xff]  ;;  %s2047_s13 = sshll.u32 %s2044_s11, 4  ;;  %s2048_s13 = int_to_ptr.hbm [resolvable:$true] %s2047_s13 }
  0x22   : > { %v379_v40 = vrot.slane %v2636_v29, 1  ;;  %v334_v41 = vrot.slane %v2643_v32, 1  ;;  %v2655_v42 = vsel %vm325_vm0, %v331_v35, %v332_v34  ;;  %v376_v45 = vrot.slane %v2612_v20, 1  ;;  %v2679_v50 = vld [vmem:[%s2569_s9 + $0x108] sm:$0xff]  ;;  %v2688_v53 = vld [vmem:[%s2569_s9 + $0x118] sm:$0x3] }
  0x23   : > { %4381 = vst [vmem:[#allocation8_spill] sm:$0xff] %v2655_v42  ;;  %v2658_v43 = vsel %vm325_vm0, %v372_v4, %v374_v36  ;;  %v2666_v46 = vsel %vm325_vm0, %v336_v31, %v337_v38  ;;  %v2694_v55 = vld [vmem:[%s2569_s9 + $0x40] sm:$0x3]  ;;  %v341_v57 = vrot.slane %v2672_v48, 1  ;;  %v342_v58 = vrot.slane %v2675_v49, 1  ;;  %v2720_v9 = vld [vmem:[%s2569_s9 + $0x68] sm:$0xff] }
  0x24   : > { %4382 = vst [vmem:[#allocation9_spill] sm:$0xff] %v2658_v43  ;;  %v2281_v44 = vpack.i.bf16 %v2655_v42, %v2658_v43  ;;  %v2669_v47 = vsel %vm325_vm0, %v377_v39, %v379_v40  ;;  %v2682_v51 = vsel %vm325_vm0, %v332_v34, %v334_v41  ;;  %v2691_v54 = vsel %vm325_vm0, %v376_v45, %v377_v39  ;;  %v2730_v15 = vld [vmem:[%s2569_s9 + $0x128] sm:$0xff]  ;;  %v2733_v17 = vld [vmem:[%s2569_s9 + $0x130] sm:$0x3]  ;;  %v2739_v19 = vld [vmem:[%s2569_s9 + $0x58] sm:$0x3] }
  0x25   : > { %4383 = vst [vmem:[#allocation10_spill] sm:$0xff] %v2666_v46  ;;  %v2296_v56 = vpack.i.bf16 %v2666_v46, %v2669_v47  ;;  %v2291_v59 = vpack.i.bf16 %v2679_v50, %v2682_v51  ;;  %v382_v60 = vrot.slane %v2685_v52, 1  ;;  %v384_v61 = vrot.slane %v2688_v53, 1  ;;  %v2755_v39 = vld [vmem:[%s2569_s9 + $0x78] sm:$0xff]  ;;  %v2768_v45 = vld [vmem:[%s2569_s9 + $0x140] sm:$0xff]  ;;  %v2845_v43 = vld [vmem:[%s2569_s9 + $0x168] sm:$0xff] }
  0x26   : > { %4384 = vst [vmem:[#allocation11_spill] sm:$0xff] %v2669_v47  ;;  %2282 = vrot.lane.b32.xlu2 %v2281_v44, %s2483_s10  ;;  %v2286_v62 = vpack.i.bf16 %v2691_v54, %v2633_v28  ;;  %v339_v63 = vrot.slane %v2694_v55, 1  ;;  %v381_v3 = vrot.slane %v2679_v50, 1  ;;  %v2711_v4 = vsel %vm325_vm0, %v341_v57, %v342_v58  ;;  %v2765_v44 = vld [vmem:[%s2569_s9 + $0x80] sm:$0xff]  ;;  %v2848_v11 = vld [vmem:[%s2569_s9 + $0xa8] sm:$0xff]  ;;  %v989_v46 = vld [vmem:[%s4286_s1 + $0x58] sm:$0xff] }
  0x27   : > { %4385 = vst [vmem:[#allocation12_spill] sm:$0xff] %v2682_v51  ;;  %v2714_v6 = vsel %vm325_vm0, %v382_v60, %v384_v61  ;;  %v346_v26 = vrot.slane %v2717_v8, 1  ;;  %v347_v31 = vrot.slane %v2720_v9, 1  ;;  %v387_v34 = vrot.slane %v2730_v15, 1  ;;  %s2433_s14 = sshra.s32 %s2048_s13, 4  ;;  %s2434_s14 = int_to_ptr.hbm [resolvable:$true] %s2433_s14 }
  0x28   : > { %2277 = vrot.lane.b32.xlu1 %v2276_v33, %s2483_s10  ;;  %4386 = vst [vmem:[#allocation13_spill] sm:$0xff] %v2691_v54  ;;  %v2727_v13 = vsel %vm325_vm0, %v337_v38, %v339_v63  ;;  %v2736_v18 = vsel %vm325_vm0, %v381_v3, %v382_v60  ;;  %v2311_v22 = vpack.i.bf16 %v2711_v4, %v2714_v6  ;;  %v389_v35 = vrot.slane %v2733_v17, 1  ;;  %v2781_v60 = vld [vmem:[%s2569_s9 + $0x70] sm:$0x3]  ;;  %s2435_s15 = scalar_lea.hbm %s2434_s14, 256  ;;  %p2440_p0 = scmp.lt.s32.totalorder %s2434_s14, %s4290_s5 }
  0x29   : > { %2267 = vrot.lane.b32.xlu0 %v2266_v37, %s2483_s10  ;;  %4387 = vst [vmem:[#allocation14_spill] sm:$0xff] %v2711_v4  ;;  %v2306_v33 = vpack.i.bf16 %v2724_v12, %v2727_v13  ;;  %v2301_v36 = vpack.i.bf16 %v2736_v18, %v2685_v52  ;;  %v344_v37 = vrot.slane %v2739_v19, 1  ;;  %v386_v38 = vrot.slane %v2724_v12, 1  ;;  %p2436_p11 = scmp.ne.s32.totalorder %s2434_s14, %s2435_s15  ;;  %p2441_p1 = scmp.lt.s32.totalorder %s2439_s23, %s2435_s15 }
  0x2a   : > { %4388 = vst [vmem:[#allocation15_spill] sm:$0xff] %v2714_v6  ;;  %v2759_v40 = vsel %vm325_vm0, %v346_v26, %v347_v31  ;;  %v2762_v41 = vsel %vm325_vm0, %v387_v34, %v389_v35  ;;  %v351_v63 = vrot.slane %v2755_v39, 1  ;;  %v352_v3 = vrot.slane %v2765_v44, 1  ;;  %v2813_v6 = vld [vmem:[%s2569_s9 + $0x90] sm:$0xff] }
  0x2b   : > { %4389 = vst [vmem:[#allocation16_spill] sm:$0xff] %v2727_v13  ;;  %v2775_v57 = vsel %vm325_vm0, %v342_v58, %v344_v37  ;;  %v2784_v61 = vsel %vm325_vm0, %v386_v38, %v387_v34  ;;  %v392_v58 = vrot.slane %v2768_v45, 1  ;;  %p2437_p12 = pnand %p2436_p11, %p2554_p5  ;;  %p2442_p2 = por %p2441_p1, %p2440_p0 }
  0x2c   : > { %4390 = vst [vmem:[#allocation17_spill] sm:$0xff] %v2736_v18  ;;  %v2316_v34 = vpack.i.bf16 %v2784_v61, %v2730_v15  ;;  %v2804_v37 = vsel %vm325_vm0, %v351_v63, %v352_v3  ;;  %v2826_v63 = vld [vmem:[%s2569_s9 + $0x88] sm:$0x3]  ;;  %v356_v18 = vrot.slane %v2813_v6, 1 }
  0x2d   : > { %4391 = vst [vmem:[#allocation18_spill] sm:$0xff] %v2759_v40  ;;  %p2438_p13 = pneg %p2437_p12 }
  0x2e   : > { %2287 = vrot.lane.b32.xlu2 %v2286_v62, %s2483_s10  ;;  %4392 = vst [vmem:[#allocation19_spill] sm:$0xff] %v2762_v41  ;;  %v2326_v62 = vpack.i.bf16 %v2759_v40, %v2762_v41  ;;  %v361_v40 = vrot.slane %v2848_v11, 1 }
  0x2f   : > { %4393 = vst [vmem:[#allocation20_spill] sm:$0xff] %v2775_v57  ;;  %p2443_p3 = pnand %p2442_p2, %p2438_p13 }
  0x30   : > { %2297 = vrot.lane.b32.xlu1 %v2296_v56, %s2483_s10  ;;  %v2772_v56 = vld [vmem:[%s2569_s9 + $0x138] sm:$0xff]  ;;  %4394 = vst [vmem:[#allocation21_spill] sm:$0xff] %v2784_v61 }
  0x31   : > { %2292 = vrot.lane.b32.xlu0 %v2291_v59, %s2483_s10  ;;  %v2778_v59 = vld [vmem:[%s2569_s9 + $0x148] sm:$0x3]  ;;  %v391_v35 = vrot.slane %v2772_v56, 1  ;;  %4395 = vst [vmem:[#allocation22_spill] sm:$0xff] %v2804_v37  ;;  %v2816_v61 = vld [vmem:[%s2569_s9 + $0x98] sm:$0xff] }
  0x32   : > { %v394_v26 = vrot.slane %v2778_v59, 1 }
  0x34   : > { %v2807_v38 = vsel %vm325_vm0, %v392_v58, %v394_v26  ;;  %v2829_v26 = vsel %vm325_vm0, %v391_v35, %v392_v58  ;;  %v354_v58 = vrot.slane %v2826_v63, 1 }
  0x35   : > { %4396 = vst [vmem:[#allocation23_spill] sm:$0xff] %v2807_v38  ;;  %v2331_v35 = vpack.i.bf16 %v2829_v26, %v2768_v45 }
  0x36   : > { %2302 = vrot.lane.b32.xlu2 %v2301_v36, %s2483_s10  ;;  %v2800_v36 = vld [vmem:[%s2569_s9 + $0x150] sm:$0xff]  ;;  %4398 = vst [vmem:[#allocation25_spill] sm:$0xff] %v2829_v26  ;;  %v1009_v26 = vld [vmem:[%s4286_s1 + $0xf8] sm:$0xff] }
  0x37   : > { %2202 = vmatpush.msra.mxu3 %v1009_v26  ;;  %1231 = vmatpush.msra.mxu1 %v1009_v26  ;;  %v401_v26 = vrot.slane %v2845_v43, 1 }
  0x38   : > { %2312 = vrot.lane.b32.xlu1 %v2311_v22, %s2483_s10  ;;  %v2321_v22 = vpack.i.bf16 %v2772_v56, %v2775_v57 }
  0x39   : > { %2307 = vrot.lane.b32.xlu0 %v2306_v33, %s2483_s10  ;;  %v349_v33 = vrot.slane %v2781_v60, 1 }
  0x3b   : > { %v2810_v41 = vsel %vm325_vm0, %v347_v31, %v349_v33  ;;  %v2341_v31 = vpack.i.bf16 %v2804_v37, %v2807_v38  ;;  %v396_v38 = vrot.slane %v2800_v36, 1  ;;  %v2858_v37 = vsel %vm325_vm0, %v352_v3, %v354_v58  ;;  %v2878_v3 = vld [vmem:[%s2569_s9 + $0xa0] sm:$0x3] }
  0x3c   : > { %4397 = vst [vmem:[#allocation24_spill] sm:$0xff] %v2810_v41  ;;  %v2336_v33 = vpack.i.bf16 %v2800_v36, %v2810_v41  ;;  %v270_v41 = vld [vmem:[%s2569_s9 + $0x178] sm:$0x3] }
  0x3d   : > { %4401 = vst [vmem:[#allocation28_spill] sm:$0xff] %v2858_v37 }
  0x3e   : > { %2317 = vrot.lane.b32.xlu2 %v2316_v34, %s2483_s10  ;;  %v357_v34 = vrot.slane %v2816_v61, 1 }
  0x40   : > { %2327 = vrot.lane.b32.xlu1 %v2326_v62, %s2483_s10  ;;  %v2820_v62 = vld [vmem:[%s2569_s9 + $0x158] sm:$0xff]  ;;  %v2852_v27 = vsel %vm325_vm0, %v356_v18, %v357_v34  ;;  %v2871_v18 = vld [vmem:[%s2569_s9 + $0x170] sm:$0xff] }
  0x41   : > { %2322 = vrot.lane.b32.xlu0 %v2321_v22, %s2483_s10  ;;  %v2823_v22 = vld [vmem:[%s2569_s9 + $0x160] sm:$0x3]  ;;  %v397_v47 = vrot.slane %v2820_v62, 1  ;;  %4399 = vst [vmem:[#allocation26_spill] sm:$0xff] %v2852_v27 }
  0x42   : > { %v399_v54 = vrot.slane %v2823_v22, 1 }
  0x44   : > { %v2855_v16 = vsel %vm325_vm0, %v397_v47, %v399_v54  ;;  %v2875_v54 = vsel %vm325_vm0, %v396_v38, %v397_v47  ;;  %v402_v47 = vrot.slane %v2871_v18, 1  ;;  %v404_v38 = vrot.slane %v270_v41, 1  ;;  %v992_v41 = vld [vmem:[%s4286_s1 + $0x70] sm:$0xff] }
  0x45   : > { %4400 = vst [vmem:[#allocation27_spill] sm:$0xff] %v2855_v16  ;;  %v2356_v58 = vpack.i.bf16 %v2852_v27, %v2855_v16  ;;  %v2346_v4 = vpack.i.bf16 %v2875_v54, %v2820_v62 }
  0x46   : > { %2332 = vrot.lane.b32.xlu2 %v2331_v35, %s2483_s10  ;;  %4402 = vst [vmem:[#allocation29_spill] sm:$0xff] %v2875_v54  ;;  %v2351_v35 = vpack.i.bf16 %v2845_v43, %v2858_v37  ;;  %v2897_v27 = vsel %vm325_vm0, %v402_v47, %v404_v38  ;;  %v1008_v54 = vld [vmem:[%s4286_s1 + $0xf0] sm:$0xff]  ;;  %v271_v37 = vld [vmem:[%s2569_s9 + $0x180] sm:$0xff]  ;;  %v2920_v38 = vld [vmem:[%s2569_s9 + $0xb8] sm:$0x3] }
  0x47   : > { %4404 = vst [vmem:[#allocation31_spill] sm:$0xff] %v2897_v27  ;;  %2203 = vmatpush.msra.mxu3 %v1008_v54  ;;  %1232 = vmatpush.msra.mxu1 %v1008_v54  ;;  %v364_v51 = vrot.slane %v2920_v38, 1  ;;  %v412_v54 = vrot.slane %v2626_v25, 2 }
  0x48   : > { %2342 = vrot.lane.b32.xlu1 %v2341_v31, %s2483_s10  ;;  %v993_v31 = vld [vmem:[%s4286_s1 + $0x78] sm:$0xff] }
  0x49   : > { %2337 = vrot.lane.b32.xlu0 %v2336_v33, %s2483_s10  ;;  %v2868_v33 = vld [vmem:[%s2569_s9 + $0xb0] sm:$0xff]  ;;  %2186 = vmatpush.msra.mxu2 %v993_v31 }
  0x4a   : > { %1118 = vmatpush.msra.mxu0 %v993_v31  ;;  %v362_v57 = vrot.slane %v2868_v33, 1  ;;  %v359_v31 = vrot.slane %v2878_v3, 1 }
  0x4b   : > { %2187 = vmatpush.msra.mxu2 %v992_v41 }
  0x4c   : > { %v2894_v16 = vsel %vm325_vm0, %v361_v40, %v362_v57  ;;  %v2911_v40 = vsel %vm325_vm0, %v401_v26, %v402_v47  ;;  %v1006_v47 = vld [vmem:[%s4286_s1 + $0xe0] sm:$0xff]  ;;  %1119 = vmatpush.msra.mxu0 %v992_v41  ;;  %v413_v41 = vrot.slane %v2623_v24, 2 }
  0x4d   : > { %4403 = vst [vmem:[#allocation30_spill] sm:$0xff] %v2894_v16  ;;  %v2361_v13 = vpack.i.bf16 %v2911_v40, %v2871_v18 }
  0x4e   : > { %2347 = vrot.lane.b32.xlu2 %v2346_v4, %s2483_s10  ;;  %4406 = vst [vmem:[#allocation33_spill] sm:$0xff] %v2911_v40  ;;  %v991_v4 = vld [vmem:[%s4286_s1 + $0x68] sm:$0xff] }
  0x4f   : > { %2188 = vmatpush.msra.mxu2 %v991_v4  ;;  %1120 = vmatpush.msra.mxu0 %v991_v4  ;;  %v988_v4 = vld [vmem:[%s4286_s1 + $0x50] sm:$0xff] }
  0x50   : > { %2357 = vrot.lane.b32.xlu1 %v2356_v58, %s2483_s10  ;;  %v2908_v58 = vsel %vm325_vm0, %v357_v34, %v359_v31  ;;  %v990_v34 = vld [vmem:[%s4286_s1 + $0x60] sm:$0xff]  ;;  %v2371_v31 = vpack.i.bf16 %v2894_v16, %v2897_v27  ;;  %v2952_v27 = vsel %vm325_vm0, %v362_v57, %v364_v51  ;;  %v430_v16 = vrot.slane %v2781_v60, 2 }
  0x51   : > { %2352 = vrot.lane.b32.xlu0 %v2351_v35, %s2483_s10  ;;  %4405 = vst [vmem:[#allocation32_spill] sm:$0xff] %v2908_v58  ;;  %v1007_v35 = vld [vmem:[%s4286_s1 + $0xe8] sm:$0xff]  ;;  %v2366_v26 = vpack.i.bf16 %v271_v37, %v2908_v58  ;;  %2189 = vmatpush.msra.mxu2 %v990_v34  ;;  %v1005_v37 = vld [vmem:[%s4286_s1 + $0xd8] sm:$0xff]  ;;  %v1002_v57 = vld [vmem:[%s4286_s1 + $0xc0] sm:$0xff] }
  0x52   : > { %2204 = vmatpush.msra.mxu3 %v1007_v35  ;;  %1233 = vmatpush.msra.mxu1 %v1007_v35  ;;  %v1004_v35 = vld [vmem:[%s4286_s1 + $0xd0] sm:$0xff]  ;;  %4407 = vst [vmem:[#allocation34_spill] sm:$0xff] %v2952_v27 }
  0x53   : > { %1121 = vmatpush.msra.mxu0 %v990_v34  ;;  %2190 = vmatpush.msra.mxu2 %v989_v46  ;;  %v2955_v34 = vsel %vm406_vm1, %v412_v54, %v413_v41  ;;  %v985_v54 = vld [vmem:[%s4286_s1 + $0x38] sm:$0xff] }
  0x54   : > { %2205 = vmatpush.msra.mxu3 %v1006_v47  ;;  %1234 = vmatpush.msra.mxu1 %v1006_v47  ;;  %v1003_v47 = vld [vmem:[%s4286_s1 + $0xc8] sm:$0xff]  ;;  %v2376_v51 = vpack.i.bf16 %v2952_v27, %v2955_v34 }
  0x55   : > { %2191 = vmatpush.msra.mxu2 %v988_v4  ;;  %1122 = vmatpush.msra.mxu0 %v989_v46  ;;  %v1001_v46 = vld [vmem:[%s4286_s1 + $0xb8] sm:$0xff] }
  0x56   : > { %2362 = vrot.lane.b32.xlu2 %v2361_v13, %s2483_s10  ;;  %2206 = vmatpush.msra.mxu3 %v1005_v37  ;;  %v987_v13 = vld [vmem:[%s4286_s1 + $0x48] sm:$0xff] }
  0x57   : > { %1235 = vmatpush.msra.mxu1 %v1005_v37  ;;  %2192 = vmatpush.msra.mxu2 %v987_v13  ;;  %v417_v37 = vrot.slane %v2615_v21, 2 }
  0x58   : > { %2372 = vrot.lane.b32.xlu1 %v2371_v31, %s2483_s10  ;;  %v986_v31 = vld [vmem:[%s4286_s1 + $0x40] sm:$0xff]  ;;  %2207 = vmatpush.msra.mxu3 %v1004_v35 }
  0x59   : > { %2367 = vrot.lane.b32.xlu0 %v2366_v26, %s2483_s10  ;;  %1123 = vmatpush.msra.mxu0 %v988_v4  ;;  %v272_v26 = vld [vmem:[%s2569_s9 + $0x188] sm:$0xff]  ;;  %v418_v4 = vrot.slane %v2620_v23, 2 }
  0x5a   : > { %1236 = vmatpush.msra.mxu1 %v1004_v35  ;;  %2208 = vmatpush.msra.mxu3 %v1003_v47  ;;  %v984_v35 = vld [vmem:[%s4286_s1 + $0x30] sm:$0xff] }
  0x5b   : > { %2193 = vmatpush.msra.mxu2 %v986_v31  ;;  %1124 = vmatpush.msra.mxu0 %v987_v13  ;;  %v1000_v13 = vld [vmem:[%s4286_s1 + $0xb0] sm:$0xff]  ;;  %v2998_v40 = vsel %vm406_vm1, %v417_v37, %v418_v4 }
  0x5c   : > { %1237 = vmatpush.msra.mxu1 %v1003_v47  ;;  %2209 = vmatpush.msra.mxu3 %v1002_v57  ;;  %v415_v47 = vrot.slane %v2643_v32, 2  ;;  %v982_v32 = vld [vmem:[%s4286_s1 + $0x20] sm:$0xff]  ;;  %v996_v37 = vld [vmem:[%s4286_s1 + $0x90] sm:$0xff] }
  0x5d   : > { %2194 = vmatpush.msra.mxu2 %v985_v54  ;;  %1125 = vmatpush.msra.mxu0 %v986_v31  ;;  %v998_v31 = vld [vmem:[%s4286_s1 + $0xa0] sm:$0xff] }
  0x5e   : > { %735 = vrot.lane.b32.xlu2 %v272_v26, %s2483_s10  ;;  %2210 = vmatpush.msra.mxu3 %v1001_v46  ;;  %v999_v26 = vld [vmem:[%s4286_s1 + $0xa8] sm:$0xff]  ;;  %v3004_v27 = vsel %vm406_vm1, %v413_v41, %v415_v47  ;;  %v997_v41 = vld [vmem:[%s4286_s1 + $0x98] sm:$0xff] }
  0x5f   : > { %1238 = vmatpush.msra.mxu1 %v1002_v57  ;;  %2195 = vmatpush.msra.mxu2 %v984_v35  ;;  %v981_v57 = vld [vmem:[%s4286_s1 + $0x18] sm:$0xff]  ;;  %v995_v47 = vld [vmem:[%s4286_s1 + $0x88] sm:$0xff] }
  0x60   : > { %673 = vrot.lane.b32.xlu1 %v2626_v25, %s2483_s10  ;;  %2211 = vmatpush.msra.mxu3 %v1000_v13 }
  0x61   : > { %2377 = vrot.lane.b32.xlu0 %v2376_v51, %s2483_s10  ;;  %v983_v51 = vld [vmem:[%s4286_s1 + $0x28] sm:$0xff]  ;;  %1126 = vmatpush.msra.mxu0 %v985_v54  ;;  %v980_v54 = vld [vmem:[%s4286_s1 + $0x10] sm:$0xff] }
  0x62   : > { %1239 = vmatpush.msra.mxu1 %v1001_v46  ;;  %2196 = vmatpush.msra.mxu2 %v983_v51  ;;  %v420_v46 = vrot.slane %v2694_v55, 2  ;;  %v423_v55 = vrot.slane %v2675_v49, 2 }
  0x63   : > { %2212 = vmatpush.msra.mxu3 %v999_v26  ;;  %1127 = vmatpush.msra.mxu0 %v984_v35 }
  0x64   : > { %1240 = vmatpush.msra.mxu1 %v1000_v13  ;;  %2197 = vmatpush.msra.mxu2 %v982_v32  ;;  %v3029_v35 = vsel %vm406_vm1, %v418_v4, %v420_v46  ;;  %v425_v13 = vrot.slane %v2739_v19, 2  ;;  %v979_v4 = vld [vmem:[%s4286_s1 + $0x8] sm:$0xff]  ;;  %v994_v19 = vld [vmem:[%s4286_s1 + $0x80] sm:$0xff]  ;;  %v428_v46 = vrot.slane %v2720_v9, 2 }
  0x65   : > { %2213 = vmatpush.msra.mxu3 %v998_v31  ;;  %1128 = vmatpush.msra.mxu0 %v983_v51  ;;  %v978_v51 = vld [vmem:[%s4286_s1] sm:$0xff] }
  0x66   : > { %771 = vrot.lane.b32.xlu2 %v3004_v27, %s2483_s10  ;;  %2198 = vmatpush.msra.mxu2 %v981_v57  ;;  %v3130_v60 = vsel %vm406_vm1, %v428_v46, %v430_v16 }
  0x67   : > { %1241 = vmatpush.msra.mxu1 %v999_v26  ;;  %2214 = vmatpush.msra.mxu3 %v997_v41  ;;  %v3052_v26 = vsel %vm406_vm1, %v423_v55, %v425_v13  ;;  %v1040_v13 = vld [vmem:[%s4286_s1 + $0x1f0] sm:$0xff]  ;;  %4412 = vst [vmem:[#allocation39_spill] sm:$0xff] %v3130_v60 }
  0x68   : > { %773 = vrot.lane.b32.xlu1 %v2998_v40, %s2483_s10  ;;  %2199 = vmatpush.msra.mxu2 %v980_v54  ;;  %4408 = vst [vmem:[#allocation35_spill] sm:$0xff] %v3052_v26 }
  0x69   : > { %675 = vrot.lane.b32.xlu0 %v2623_v24, %s2483_s10  ;;  %1129 = vmatpush.msra.mxu0 %v982_v32  ;;  %v422_v32 = vrot.slane %v2672_v48, 2 }
  0x6a   : > { %1242 = vmatpush.msra.mxu1 %v998_v31  ;;  %2215 = vmatpush.msra.mxu3 %v996_v37  ;;  %v1025_v31 = vld [vmem:[%s4286_s1 + $0x178] sm:$0xff] }
  0x6b   : > { %1130 = vmatpush.msra.mxu0 %v981_v57  ;;  %2200 = vmatpush.msra.mxu2 %v979_v4  ;;  %v1041_v57 = vld [vmem:[%s4286_s1 + $0x1f8] sm:$0xff] }
  0x6c   : > { %1243 = vmatpush.msra.mxu1 %v997_v41  ;;  %2216 = vmatpush.msra.mxu3 %v995_v47  ;;  %v3064_v41 = vsel %vm406_vm1, %v422_v32, %v423_v55  ;;  %v1024_v55 = vld [vmem:[%s4286_s1 + $0x170] sm:$0xff] }
  0x6d   : > { %1131 = vmatpush.msra.mxu0 %v980_v54  ;;  %2201 = vmatpush.msra.mxu2 %v978_v51  ;;  %v427_v54 = vrot.slane %v2717_v8, 2 }
  0x6e   : > { %677 = vrot.lane.b32.xlu2 %v2615_v21, %s2483_s10  ;;  %1244 = vmatpush.msra.mxu1 %v996_v37 }
  0x6f   : > { %1132 = vmatpush.msra.mxu0 %v979_v4  ;;  %2217 = vmatpush.msra.mxu3 %v994_v19  ;;  %v3073_v37 = vsel %vm406_vm1, %v427_v54, %v428_v46  ;;  %v1049_v4 = vld [vmem:[%s4286_s1 + $0x238] sm:$0xff]  ;;  %v435_v54 = vrot.slane %v2826_v63, 2  ;;  %v1038_v63 = vld [vmem:[%s4286_s1 + $0x1e0] sm:$0xff]  ;;  %v450_v46 = vrot.slane %v2599_v14, 2 }
  0x70   : > { %679 = vrot.lane.b32.xlu1 %v2620_v23, %s2483_s10  ;;  %1245 = vmatpush.msra.mxu1 %v995_v47  ;;  %4409 = vst [vmem:[#allocation36_spill] sm:$0xff] %v3073_v37  ;;  %v432_v47 = vrot.slane %v2755_v39, 2 }
  0x71   : > { %775 = vrot.lane.b32.xlu0 %v3029_v35, %s2483_s10  ;;  %1133 = vmatpush.msra.mxu0 %v978_v51  ;;  %v433_v51 = vrot.slane %v2765_v44, 2 }
  0x72   : > { %1246 = vmatpush.msra.mxu1 %v994_v19  ;;  %1344 = vmatpush.msrb.mxu2 %v1025_v31  ;;  %v1023_v31 = vld [vmem:[%s4286_s1 + $0x168] sm:$0xff] }
  0x73   : > { %1457 = vmatpush.msrb.mxu3 %v1041_v57  ;;  %1578 = vmatpush.msrb.mxu0 %v1049_v4  ;;  %v3095_v32 = vsel %vm406_vm1, %v432_v47, %v433_v51  ;;  %v1039_v57 = vld [vmem:[%s4286_s1 + $0x1e8] sm:$0xff]  ;;  %v448_v4 = vrot.slane %v2583_v5, 2 }
  0x74   : > { %1345 = vmatpush.msrb.mxu2 %v1024_v55  ;;  %4410 = vst [vmem:[#allocation37_spill] sm:$0xff] %v3095_v32  ;;  %v3109_v55 = vsel %vm406_vm1, %v433_v51, %v435_v54  ;;  %v1048_v51 = vld [vmem:[%s4286_s1 + $0x230] sm:$0xff] }
  0x75   : > { %1458 = vmatpush.msrb.mxu3 %v1040_v13  ;;  %4411 = vst [vmem:[#allocation38_spill] sm:$0xff] %v3109_v55  ;;  %v447_v13 = vrot.slane %v2578_v2, 2  ;;  %1579 = vmatpush.msrb.mxu0 %v1048_v51 }
  0x76   : > { %777 = vrot.lane.b32.xlu2 %v3064_v41, %s2483_s10  ;;  %1346 = vmatpush.msrb.mxu2 %v1023_v31 }
  0x77   : > { %1459 = vmatpush.msrb.mxu3 %v1039_v57  ;;  %v3133_v57 = vsel %vm406_vm1, %v447_v13, %v448_v4  ;;  %v438_v13 = vrot.slane %v2816_v61, 2 }
  0x78   : > { %779 = vrot.lane.b32.xlu1 %v3052_v26, %s2483_s10 }
  0x79   : > { %681 = vrot.lane.b32.xlu0 %v2672_v48, %s2483_s10  ;;  %1460 = vmatpush.msrb.mxu3 %v1038_v63  ;;  %v1021_v63 = vld [vmem:[%s4286_s1 + $0x158] sm:$0xff] }
  0x7e   : > { %683 = vrot.lane.b32.xlu2 %v2675_v49, %s2483_s10 }
  0x80   : > { %685 = vrot.lane.b32.xlu1 %v2717_v8, %s2483_s10  ;;  %v3092_v19 = vpop.permute.xlu2 %2282 }
  0x81   : > { %781 = vrot.lane.b32.xlu0 %v3073_v37, %s2483_s10 }
  0x86   : > { %783 = vrot.lane.b32.xlu2 %v3130_v60, %s2483_s10 }
  0x88   : > { %785 = vrot.lane.b32.xlu1 %v3095_v32, %s2483_s10  ;;  %v3113_v47 = vpop.permute.xlu2 %2287 }
  0x89   : > { %687 = vrot.lane.b32.xlu0 %v2720_v9, %s2483_s10  ;;  %v1022_v9 = vld [vmem:[%s4286_s1 + $0x160] sm:$0xff] }
  0x8a   : > { %1347 = vmatpush.msrb.mxu2 %v1022_v9  ;;  %v440_v9 = vrot.slane %v2878_v3, 2  ;;  %v3161_v3 = vsel %vm406_vm1, %v448_v4, %v450_v46  ;;  %v452_v46 = vrot.slane %v2572_v0, 2 }
  0x8c   : > { %1348 = vmatpush.msrb.mxu2 %v1021_v63  ;;  %v3158_v14 = vsel %vm406_vm1, %v438_v13, %v440_v9 }
  0x8d   : > { %4414 = vst [vmem:[#allocation41_spill] sm:$0xff] %v3158_v14 }
  0x8e   : > { %689 = vrot.lane.b32.xlu2 %v2755_v39, %s2483_s10  ;;  %v442_v39 = vrot.slane %v2848_v11, 2 }
  0x90   : > { %691 = vrot.lane.b32.xlu1 %v2765_v44, %s2483_s10 }
  0x91   : > { %787 = vrot.lane.b32.xlu0 %v3109_v55, %s2483_s10 }
  0x92   : > { %v2273_v44 = vpop.permute.xlu1 %2272 }
  0x93   : > { %v2263_v31 = vpop.permute.xlu0 %2262  ;;  %v2274_v51 = vunpack.i.l.bf16 %v2273_v44 }
  0x94   : > { %v2265_v54 = vunpack.i.h.bf16 %v2263_v31  ;;  %v2264_v58 = vunpack.i.l.bf16 %v2263_v31  ;;  %v3153_v31 = vpop.permute.xlu2 %2302 }
  0x95   : > { %v927_v63 = vsel %vm877_vm2, %v3161_v3, %v2274_v51  ;;  %v1047_v51 = vld [vmem:[%s4286_s1 + $0x228] sm:$0xff] }
  0x96   : > { %v3139_v55 = vsel %vm877_vm2, %v2578_v2, %v2264_v58  ;;  %v926_v16 = vsel %vm877_vm2, %v3133_v57, %v2265_v54  ;;  %v1037_v58 = vld [vmem:[%s4286_s1 + $0x1d8] sm:$0xff]  ;;  %1580 = vmatpush.msrb.mxu0 %v1047_v51 }
  0x97   : > { %4413 = vst [vmem:[#allocation40_spill] sm:$0xff] %v3139_v55  ;;  %1182 = vmatmul.f32.vlgmr.msra.gmra.mxu2 %v3139_v55  ;;  %1295 = vmatmul.f32.vlgmr.msra.gmra.mxu3 %v926_v16 }
  0x98   : > { %1461 = vmatpush.msrb.mxu3 %v1037_v58  ;;  %791 = vrot.lane.b32.xlu1 %v3158_v14, %s2483_s10  ;;  %v453_v58 = vrot.slane %v2575_v1, 2 }
  0x99   : > { %693 = vrot.lane.b32.xlu0 %v2813_v6, %s2483_s10 }
  0x9a   : > { %v2278_v54 = vpop.permute.xlu1 %2277  ;;  %v3197_v42 = vsel %vm406_vm1, %v452_v46, %v453_v58 }
  0x9b   : > { %v2268_v16 = vpop.permute.xlu0 %2267  ;;  %v2279_v14 = vunpack.i.l.bf16 %v2278_v54 }
  0x9c   : > { %v2270_v55 = vunpack.i.h.bf16 %v2268_v16  ;;  %v2269_v32 = vunpack.i.l.bf16 %v2268_v16  ;;  %v443_v16 = vrot.slane %v2868_v33, 2  ;;  %v3201_v26 = vpop.permute.xlu2 %2317 }
  0x9e   : > { %v878_v9 = vsel %vm877_vm2, %v2592_v10, %v2270_v55  ;;  %v3173_v4 = vsel %vm877_vm2, %v2583_v5, %v2269_v32  ;;  %v1020_v55 = vld [vmem:[%s4286_s1 + $0x150] sm:$0xff] }
  0x9f   : > { %4415 = vst [vmem:[#allocation42_spill] sm:$0xff] %v3173_v4  ;;  %1134 = vmatmul.f32.vlgmr.msra.gmra.mxu0 %v878_v9  ;;  %1185 = vmatmul.f32.gmra.mxu2 %v3173_v4  ;;  %v1036_v32 = vld [vmem:[%s4286_s1 + $0x1d0] sm:$0xff]  ;;  %v2280_v9 = vunpack.i.h.bf16 %v2278_v54  ;;  %v3192_v4 = vsel %vm406_vm1, %v442_v39, %v443_v16  ;;  %v879_v54 = vsel %vm877_vm2, %v2587_v7, %v2279_v14  ;;  %v455_v39 = vrot.slane %v2639_v30, 2  ;;  %v1035_v7 = vld [vmem:[%s4286_s1 + $0x1c8] sm:$0xff] }
  0xa0   : > { %1298 = vmatmul.f32.gmra.mxu3 %v927_v63  ;;  %1349 = vmatpush.msrb.mxu2 %v1020_v55  ;;  %v2275_v63 = vunpack.i.h.bf16 %v2273_v44  ;;  %v1019_v55 = vld [vmem:[%s4286_s1 + $0x148] sm:$0xff]  ;;  %v2289_v14 = vunpack.i.l.bf16 %v3113_v47  ;;  %v2285_v30 = vunpack.i.h.bf16 %v3092_v19 }
  0xa1   : > { %1462 = vmatpush.msrb.mxu3 %v1036_v32  ;;  %697 = vrot.lane.b32.xlu1 %v2848_v11, %s2483_s10  ;;  %v928_v44 = vsel %vm877_vm2, %v3197_v42, %v2280_v9  ;;  %v437_v11 = vrot.slane %v2813_v6, 2  ;;  %v2284_v6 = vunpack.i.l.bf16 %v3092_v19  ;;  %v3231_v51 = vsel %vm406_vm1, %v453_v58, %v455_v39 }
  0xa2   : > { %v3194_v60 = vpop.permute.xlu1 %2297  ;;  %793 = vrot.lane.b32.xlu0 %v3192_v4, %s2483_s10  ;;  %v3211_v46 = vsel %vm877_vm2, %v2572_v0, %v2275_v63  ;;  %1350 = vmatpush.msrb.mxu2 %v1019_v55  ;;  %v880_v58 = vsel %vm877_vm2, %v2626_v25, %v2285_v30  ;;  %v1034_v25 = vld [vmem:[%s4286_s1 + $0x1c0] sm:$0xff] }
  0xa3   : > { %v2293_v37 = vpop.permute.xlu0 %2292  ;;  %1463 = vmatpush.msrb.mxu3 %v1035_v7  ;;  %v3224_v0 = vsel %vm406_vm1, %v437_v11, %v438_v13  ;;  %v929_v13 = vsel %vm877_vm2, %v3231_v51, %v2289_v14  ;;  %v3249_v63 = vsel %vm877_vm2, %v2575_v1, %v2284_v6  ;;  %v1018_v11 = vld [vmem:[%s4286_s1 + $0x140] sm:$0xff]  ;;  %v2290_v7 = vunpack.i.h.bf16 %v3113_v47 }
  0xa4   : > { %789 = vrot.lane.b32.xlu2 %v3224_v0, %s2483_s10  ;;  %v3243_v19 = vpop.permute.xlu2 %2332  ;;  %v2294_v39 = vunpack.i.l.bf16 %v2293_v37  ;;  %v1046_v1 = vld [vmem:[%s4286_s1 + $0x220] sm:$0xff]  ;;  %v2295_v55 = vunpack.i.h.bf16 %v2293_v37  ;;  %1351 = vmatpush.msrb.mxu2 %v1018_v11 }
  0xa5   : > { %1464 = vmatpush.msrb.mxu3 %v1034_v25  ;;  %1581 = vmatpush.msrb.mxu0 %v1046_v1 }
  0xa6   : > { %v881_v37 = vsel %vm877_vm2, %v2623_v24, %v2294_v39  ;;  %v1017_v24 = vld [vmem:[%s4286_s1 + $0x138] sm:$0xff] }
  0xa7   : > { %1137 = vmatmul.f32.gmra.mxu0 %v879_v54  ;;  %1188 = vmatmul.f32.gmra.mxu2 %v3211_v46  ;;  %v457_v54 = vrot.slane %v2612_v20, 2 }
  0xa8   : > { %1301 = vmatmul.f32.gmra.mxu3 %v928_v44  ;;  %v458_v44 = vrot.slane %v2633_v28, 2  ;;  %1352 = vmatpush.msrb.mxu2 %v1017_v24  ;;  %v2305_v24 = vunpack.i.h.bf16 %v3153_v31 }
  0xa9   : > { %797 = vrot.lane.b32.xlu1 %v3133_v57, %s2483_s10 }
  0xaa   : > { %v3228_v32 = vpop.permute.xlu1 %2312  ;;  %699 = vrot.lane.b32.xlu0 %v2868_v33, %s2483_s10  ;;  %v3267_v30 = vsel %vm406_vm1, %v457_v54, %v458_v44  ;;  %v2299_v54 = vunpack.i.l.bf16 %v3194_v60 }
  0xab   : > { %v3237_v9 = vpop.permute.xlu0 %2307  ;;  %v930_v47 = vsel %vm877_vm2, %v3267_v30, %v2295_v55  ;;  %v462_v55 = vrot.slane %v2679_v50, 2 }
  0xac   : > { %695 = vrot.lane.b32.xlu2 %v2816_v61, %s2483_s10  ;;  %v460_v61 = vrot.slane %v2636_v29, 2  ;;  %v2304_v29 = vunpack.i.l.bf16 %v3153_v31  ;;  %v3315_v1 = vsel %vm877_vm2, %v2633_v28, %v2299_v54  ;;  %v1016_v28 = vld [vmem:[%s4286_s1 + $0x130] sm:$0xff] }
  0xad   : > { %1353 = vmatpush.msrb.mxu2 %v1016_v28  ;;  %v2319_v28 = vunpack.i.l.bf16 %v3201_v26 }
  0xae   : > { %v3301_v11 = vsel %vm406_vm1, %v458_v44, %v460_v61  ;;  %v1032_v61 = vld [vmem:[%s4286_s1 + $0x1b0] sm:$0xff] }
  0xaf   : > { %1140 = vmatmul.f32.gmra.mxu0 %v880_v58  ;;  %1191 = vmatmul.f32.gmra.mxu2 %v3249_v63  ;;  %v3287_v58 = vpop.permute.xlu2 %2347  ;;  %v931_v44 = vsel %vm877_vm2, %v3301_v11, %v2304_v29 }
  0xb0   : > { %1304 = vmatmul.f32.gmra.mxu3 %v929_v13  ;;  %v3283_v13 = vsel %vm877_vm2, %v2612_v20, %v2290_v7  ;;  %v1033_v20 = vld [vmem:[%s4286_s1 + $0x1b8] sm:$0xff]  ;;  %v463_v7 = vrot.slane %v2685_v52, 2 }
  0xb1   : > { %703 = vrot.lane.b32.xlu1 %v2583_v5, %s2483_s10  ;;  %v2300_v5 = vunpack.i.h.bf16 %v3194_v60  ;;  %1465 = vmatpush.msrb.mxu3 %v1033_v20 }
  0xb2   : > { %v3264_v14 = vpop.permute.xlu1 %2327  ;;  %799 = vrot.lane.b32.xlu0 %v3161_v3, %s2483_s10  ;;  %v3347_v29 = vsel %vm406_vm1, %v462_v55, %v463_v7  ;;  %v470_v55 = vrot.slane %v2733_v17, 2  ;;  %v1031_v17 = vld [vmem:[%s4286_s1 + $0x1a8] sm:$0xff] }
  0xb3   : > { %v3271_v6 = vpop.permute.xlu0 %2322  ;;  %v3311_v60 = vsel %vm877_vm2, %v2615_v21, %v2300_v5  ;;  %v445_v21 = vrot.slane %v2920_v38, 2  ;;  %v2310_v5 = vunpack.i.h.bf16 %v3237_v9  ;;  %1466 = vmatpush.msrb.mxu3 %v1032_v61  ;;  %4416 = vst [vmem:[#allocation43_spill] sm:$0xff] %v3347_v29 }
  0xb5   : > { %v3341_v38 = vsel %vm406_vm1, %v443_v16, %v445_v21  ;;  %v932_v31 = vsel %vm877_vm2, %v3347_v29, %v2310_v5  ;;  %v3368_v16 = vsel %vm877_vm2, %v2679_v50, %v2305_v24  ;;  %v2314_v21 = vunpack.i.l.bf16 %v3228_v32  ;;  %v1015_v50 = vld [vmem:[%s4286_s1 + $0x128] sm:$0xff]  ;;  %1467 = vmatpush.msrb.mxu3 %v1031_v17 }
  0xb6   : > { %795 = vrot.lane.b32.xlu2 %v3341_v38, %s2483_s10  ;;  %1354 = vmatpush.msrb.mxu2 %v1015_v50 }
  0xb7   : > { %1143 = vmatmul.f32.gmra.mxu0 %v881_v37  ;;  %1194 = vmatmul.f32.gmra.mxu2 %v3283_v13  ;;  %v465_v37 = vrot.slane %v2688_v53, 2  ;;  %v1045_v53 = vld [vmem:[%s4286_s1 + $0x218] sm:$0xff]  ;;  %v3336_v54 = vpop.permute.xlu2 %2362 }
  0xb8   : > { %1307 = vmatmul.f32.gmra.mxu3 %v930_v47  ;;  %v2309_v47 = vunpack.i.l.bf16 %v3237_v9  ;;  %1582 = vmatpush.msrb.mxu0 %v1045_v53 }
  0xb9   : > { %805 = vrot.lane.b32.xlu1 %v3267_v30, %s2483_s10 }
  0xba   : > { %v3298_v39 = vpop.permute.xlu1 %2342  ;;  %803 = vrot.lane.b32.xlu0 %v3231_v51, %s2483_s10  ;;  %v3362_v33 = vsel %vm877_vm2, %v2620_v23, %v2309_v47  ;;  %v2315_v23 = vunpack.i.h.bf16 %v3228_v32  ;;  %v468_v47 = vrot.slane %v2730_v15, 2 }
  0xbb   : > { %v3303_v25 = vpop.permute.xlu0 %2337 }
  0xbc   : > { %v3388_v32 = vsel %vm406_vm1, %v468_v47, %v470_v55  ;;  %v3411_v55 = vsel %vm877_vm2, %v2685_v52, %v2314_v21  ;;  %v1030_v52 = vld [vmem:[%s4286_s1 + $0x1a0] sm:$0xff]  ;;  %v1044_v21 = vld [vmem:[%s4286_s1 + $0x210] sm:$0xff] }
  0xbd   : > { %4418 = vst [vmem:[#allocation45_spill] sm:$0xff] %v3411_v55  ;;  %1468 = vmatpush.msrb.mxu3 %v1030_v52  ;;  %1583 = vmatpush.msrb.mxu0 %v1044_v21  ;;  %v2404_v52 = vld [vmem:[%s2569_s9 + $0x10] sm:$0x3] }
  0xbe   : > { %701 = vrot.lane.b32.xlu2 %v2578_v2, %s2483_s10  ;;  %v407_v2 = vrot.slane %v2592_v10, 2  ;;  %v1014_v10 = vld [vmem:[%s4286_s1 + $0x120] sm:$0xff]  ;;  %v410_v21 = vrot.slane %v2404_v52, 2 }
  0xbf   : > { %1146 = vmatmul.f32.gmra.mxu0 %v3311_v60  ;;  %1197 = vmatmul.f32.gmra.mxu2 %v3315_v1  ;;  %v3399_v24 = vpop.permute.xlu2 %735 }
  0xc0   : > { %1310 = vmatmul.f32.gmra.mxu3 %v931_v44  ;;  %v3350_v44 = vsel %vm406_vm1, %v463_v7, %v465_v37  ;;  %v472_v7 = vrot.slane %v2772_v56, 2  ;;  %v4365_v37 = vrot.slane %v2768_v45, 2  ;;  %1355 = vmatpush.msrb.mxu2 %v1014_v10  ;;  %v477_v10 = vrot.slane %v2800_v36, 2 }
  0xc1   : > { %4417 = vst [vmem:[#allocation44_spill] sm:$0xff] %v3350_v44  ;;  %811 = vrot.lane.b32.xlu1 %v3350_v44, %s2483_s10  ;;  %v933_v17 = vsel %vm877_vm2, %v3350_v44, %v2319_v28  ;;  %v2325_v28 = vunpack.i.h.bf16 %v3271_v6  ;;  %v2330_v36 = vunpack.i.h.bf16 %v3264_v14 }
  0xc2   : > { %v3344_v20 = vpop.permute.xlu1 %2357  ;;  %809 = vrot.lane.b32.xlu0 %v3347_v29, %s2483_s10  ;;  %v3393_v53 = vsel %vm406_vm1, %v472_v7, %v4365_v37  ;;  %v2403_v7 = vld [vmem:[%s2569_s9 + $0x8] sm:$0xff]  ;;  %v467_v37 = vrot.slane %v2724_v12, 2 }
  0xc3   : > { %v3354_v9 = vpop.permute.xlu0 %2352  ;;  %v408_v50 = vrot.slane %v2403_v7, 2  ;;  %v2320_v7 = vunpack.i.h.bf16 %v3201_v26  ;;  %v478_v26 = vrot.slane %v2820_v62, 2  ;;  %v2329_v62 = vunpack.i.l.bf16 %v3264_v14 }
  0xc5   : > { %v3454_v29 = vsel %vm877_vm2, %v2724_v12, %v2320_v7  ;;  %v1029_v12 = vld [vmem:[%s4286_s1 + $0x198] sm:$0xff]  ;;  %v3478_v7 = vsel %vm877_vm2, %v2717_v8, %v2330_v36  ;;  %v1043_v36 = vld [vmem:[%s4286_s1 + $0x208] sm:$0xff] }
  0xc6   : > { %801 = vrot.lane.b32.xlu2 %v3197_v42, %s2483_s10  ;;  %1469 = vmatpush.msrb.mxu3 %v1029_v12  ;;  %v2405_v12 = vld [vmem:[%s2569_s9 + $0x68] sm:$0xff] }
  0xc7   : > { %1149 = vmatmul.f32.gmra.mxu0 %v3362_v33  ;;  %1200 = vmatmul.f32.gmra.mxu2 %v3368_v16 }
  0xc8   : > { %1313 = vmatmul.f32.gmra.mxu3 %v932_v31  ;;  %v3407_v31 = vsel %vm877_vm2, %v2672_v48, %v2315_v23  ;;  %v2324_v48 = vunpack.i.l.bf16 %v3271_v6  ;;  %v409_v23 = vsel %vm406_vm1, %v407_v2, %v408_v50  ;;  %1584 = vmatpush.msrb.mxu0 %v1043_v36 }
  0xc9   : > { %817 = vrot.lane.b32.xlu1 %v3393_v53, %s2483_s10 }
  0xca   : > { %v3385_v61 = vpop.permute.xlu1 %2372  ;;  %815 = vrot.lane.b32.xlu0 %v3388_v32, %s2483_s10  ;;  %v3443_v6 = vsel %vm877_vm2, %v2675_v49, %v2324_v48  ;;  %v3459_v49 = vsel %vm406_vm1, %v477_v10, %v478_v26  ;;  %v2334_v48 = vunpack.i.l.bf16 %v3243_v19  ;;  %v480_v10 = vrot.slane %v2823_v22, 2  ;;  %v1012_v22 = vld [vmem:[%s4286_s1 + $0x110] sm:$0xff] }
  0xcb   : > { %v3397_v5 = vpop.permute.xlu0 %2367  ;;  %4419 = vst [vmem:[#allocation46_spill] sm:$0xff] %v3459_v49 }
  0xcc   : > { %v3492_v8 = vsel %vm406_vm1, %v478_v26, %v480_v10  ;;  %v2340_v26 = vunpack.i.h.bf16 %v3303_v25  ;;  %v2344_v10 = vunpack.i.l.bf16 %v3298_v39 }
  0xcd   : > { %4420 = vst [vmem:[#allocation47_spill] sm:$0xff] %v3492_v8 }
  0xce   : > { %807 = vrot.lane.b32.xlu2 %v3301_v11, %s2483_s10  ;;  %v3551_v36 = vsel %vm877_vm2, %v2768_v45, %v2344_v10  ;;  %v2407_v10 = vld [vmem:[%s2569_s9 + $0x80] sm:$0xff] }
  0xcf   : > { %1152 = vmatmul.f32.gmra.mxu0 %v3407_v31  ;;  %1203 = vmatmul.f32.gmra.mxu2 %v3411_v55 }
  0xd0   : > { %1316 = vmatmul.f32.gmra.mxu3 %v933_v17  ;;  %v3434_v17 = vsel %vm406_vm1, %v467_v37, %v468_v47  ;;  %v3449_v47 = vpop.permute.xlu2 %771 }
  0xd1   : > { %v934_v37 = vsel %vm877_vm2, %v3434_v17, %v2325_v28  ;;  %823 = vrot.lane.b32.xlu1 %v3492_v8, %s2483_s10 }
  0xd2   : > { %v674_v2 = vpop.permute.xlu1 %673  ;;  %821 = vrot.lane.b32.xlu0 %v3459_v49, %s2483_s10 }
  0xd3   : > { %v3438_v44 = vpop.permute.xlu0 %2377  ;;  %v910_v55 = vsel %vm877_vm2, %v409_v23, %v674_v2  ;;  %v411_v23 = vsel %vm406_vm1, %v408_v50, %v410_v21  ;;  %v3482_v2 = vsel %vm877_vm2, %v2730_v15, %v2329_v62  ;;  %v935_v50 = vsel %vm877_vm2, %v3388_v32, %v2334_v48  ;;  %v1028_v21 = vld [vmem:[%s4286_s1 + $0x190] sm:$0xff] }
  0xd4   : > { %1247 = vmatmul.f32.vlgmr.msra.gmra.mxu1 %v910_v55  ;;  %v1013_v55 = vld [vmem:[%s4286_s1 + $0x118] sm:$0xff]  ;;  %v2339_v15 = vunpack.i.l.bf16 %v3303_v25  ;;  %1470 = vmatpush.msrb.mxu3 %v1028_v21  ;;  %v2335_v62 = vunpack.i.h.bf16 %v3243_v19 }
  0xd5   : > { %1356 = vmatpush.msrb.mxu2 %v1013_v55 }
  0xd6   : > { %813 = vrot.lane.b32.xlu2 %v3434_v17, %s2483_s10  ;;  %v3514_v48 = vsel %vm877_vm2, %v2405_v12, %v2339_v15  ;;  %v1026_v12 = vld [vmem:[%s4286_s1 + $0x180] sm:$0xff] }
  0xd7   : > { %1155 = vmatmul.f32.gmra.mxu0 %v3443_v6  ;;  %1206 = vmatmul.f32.gmra.mxu2 %v3454_v29 }
  0xd8   : > { %1319 = vmatmul.f32.gmra.mxu3 %v934_v37  ;;  %v678_v52 = vpop.permute.xlu2 %677  ;;  %1357 = vmatpush.msrb.mxu2 %v1012_v22  ;;  %v2406_v22 = vld [vmem:[%s2569_s9 + $0x78] sm:$0xff] }
  0xd9   : > { %v912_v55 = vsel %vm877_vm2, %v2955_v34, %v678_v52  ;;  %v3523_v34 = vsel %vm877_vm2, %v2772_v56, %v2335_v62  ;;  %v2349_v56 = vunpack.i.l.bf16 %v3287_v58  ;;  %v4421_v52 = vrot.slane %v2768_v45, 2  ;;  %v1010_v45 = vld [vmem:[%s4286_s1 + $0x100] sm:$0xff] }
  0xda   : > { %v3487_v37 = vpop.permute.xlu1 %773 }
  0xdb   : > { %v676_v14 = vpop.permute.xlu0 %675 }
  0xdc   : > { %v911_v28 = vsel %vm877_vm2, %v411_v23, %v676_v14  ;;  %v936_v23 = vsel %vm877_vm2, %v3393_v53, %v2340_v26  ;;  %v475_v14 = vrot.slane %v2778_v59, 2  ;;  %v1027_v59 = vld [vmem:[%s4286_s1 + $0x188] sm:$0xff] }
  0xdd   : > { %1250 = vmatmul.f32.gmra.mxu1 %v911_v28  ;;  %v2345_v28 = vunpack.i.h.bf16 %v3298_v39  ;;  %1471 = vmatpush.msrb.mxu3 %v1027_v59 }
  0xde   : > { %v3539_v15 = vsel %vm406_vm1, %v4421_v52, %v475_v14  ;;  %v2355_v14 = vunpack.i.h.bf16 %v3354_v9 }
  0xdf   : > { %1158 = vmatmul.f32.gmra.mxu0 %v3478_v7  ;;  %1209 = vmatmul.f32.gmra.mxu2 %v3482_v2  ;;  %4422 = vst [vmem:[#allocation48_spill] sm:$0xff] %v3539_v15  ;;  %v3547_v21 = vsel %vm877_vm2, %v2406_v22, %v2345_v28  ;;  %v937_v26 = vsel %vm877_vm2, %v3539_v15, %v2349_v56  ;;  %v2359_v22 = vunpack.i.l.bf16 %v3344_v20 }
  0xe0   : > { %1322 = vmatmul.f32.gmra.mxu3 %v935_v50  ;;  %v1011_v50 = vld [vmem:[%s4286_s1 + $0x108] sm:$0xff]  ;;  %819 = vrot.lane.b32.xlu2 %v3539_v15, %s2483_s10  ;;  %v3555_v62 = vpop.permute.xlu2 %777  ;;  %v938_v59 = vsel %vm877_vm2, %v3459_v49, %v2355_v14 }
  0xe1   : > { %1358 = vmatpush.msrb.mxu2 %v1011_v50  ;;  %1472 = vmatpush.msrb.mxu3 %v1026_v12  ;;  %v2410_v12 = vld [vmem:[%s2569_s9 + $0x158] sm:$0xff] }
  0xe2   : > { %v680_v19 = vpop.permute.xlu1 %679 }
  0xe3   : > { %v3518_v25 = vpop.permute.xlu0 %775  ;;  %v913_v39 = vsel %vm877_vm2, %v3004_v27, %v680_v19  ;;  %1359 = vmatpush.msrb.mxu2 %v1010_v45  ;;  %v2350_v19 = vunpack.i.h.bf16 %v3287_v58 }
  0xe5   : > { %1253 = vmatmul.f32.gmra.mxu1 %v912_v55  ;;  %v2354_v55 = vunpack.i.l.bf16 %v3354_v9  ;;  %v2408_v9 = vld [vmem:[%s2569_s9 + $0x150] sm:$0xff] }
  0xe6   : > { %v3583_v52 = vsel %vm877_vm2, %v2408_v9, %v2350_v19  ;;  %v482_v19 = vrot.slane %v2845_v43, 2  ;;  %v2370_v9 = vunpack.i.h.bf16 %v3397_v5 }
  0xe7   : > { %1161 = vmatmul.f32.gmra.mxu0 %v3514_v48  ;;  %1212 = vmatmul.f32.gmra.mxu2 %v3523_v34  ;;  %v3575_v50 = vsel %vm877_vm2, %v2407_v10, %v2354_v55  ;;  %4423 = vst [vmem:[#allocation49_spill] sm:$0xff] %v3583_v52  ;;  %v2409_v55 = vld [vmem:[%s2569_s9 + $0x90] sm:$0xff] }
  0xe8   : > { %1325 = vmatmul.f32.gmra.mxu3 %v936_v23  ;;  %v1042_v23 = vld [vmem:[%s4286_s1 + $0x200] sm:$0xff]  ;;  %v684_v58 = vpop.permute.xlu2 %683 }
  0xe9   : > { %1585 = vmatpush.msrb.mxu0 %v1042_v23  ;;  %v3598_v23 = vsel %vm877_vm2, %v2410_v12, %v2359_v22  ;;  %v2413_v12 = vld [vmem:[%s2569_s9 + $0x178] sm:$0x3] }
  0xea   : > { %v3579_v56 = vpop.permute.xlu1 %779  ;;  %4424 = vst [vmem:[#allocation50_spill] sm:$0xff] %v3598_v23 }
  0xeb   : > { %v682_v27 = vpop.permute.xlu0 %681 }
  0xec   : > { %v914_v28 = vsel %vm877_vm2, %v2998_v40, %v682_v27  ;;  %v915_v27 = vsel %vm877_vm2, %v3029_v35, %v684_v58  ;;  %v2365_v58 = vunpack.i.h.bf16 %v3336_v54 }
  0xed   : > { %1256 = vmatmul.f32.gmra.mxu1 %v913_v39  ;;  %v2360_v39 = vunpack.i.h.bf16 %v3344_v20 }
  0xef   : > { %1164 = vmatmul.f32.gmra.mxu0 %v3547_v21  ;;  %1215 = vmatmul.f32.gmra.mxu2 %v3551_v36  ;;  %v3594_v45 = vsel %vm877_vm2, %v2409_v55, %v2360_v39 }
  0xf0   : > { %1328 = vmatmul.f32.gmra.mxu3 %v937_v26  ;;  %v2364_v26 = vunpack.i.l.bf16 %v3336_v54  ;;  %v1722_v54 = vld [vmem:[%s4288_s3 + $0x38] sm:$0xff] }
  0xf1   : > { %1831 = vmatpush.msrb.mxu1 %v1722_v54 }
  0xf2   : > { %v939_v14 = vsel %vm877_vm2, %v3492_v8, %v2364_v26  ;;  %v686_v10 = vpop.permute.xlu1 %685 }
  0xf3   : > { %v3602_v20 = vpop.permute.xlu0 %781  ;;  %v916_v39 = vsel %vm877_vm2, %v3064_v41, %v686_v10  ;;  %v2375_v10 = vunpack.i.h.bf16 %v3385_v61 }
  0xf5   : > { %1259 = vmatmul.f32.gmra.mxu1 %v914_v28  ;;  %v483_v28 = vrot.slane %v2871_v18, 2  ;;  %v2411_v18 = vld [vmem:[%s2569_s9 + $0x98] sm:$0xff] }
  0xf7   : > { %1167 = vmatmul.f32.gmra.mxu0 %v3575_v50  ;;  %1218 = vmatmul.f32.gmra.mxu2 %v3583_v52  ;;  %v3614_v43 = vsel %vm406_vm1, %v482_v19, %v483_v28 }
  0xf8   : > { %1331 = vmatmul.f32.gmra.mxu3 %v938_v59  ;;  %v2369_v59 = vunpack.i.l.bf16 %v3397_v5  ;;  %v940_v26 = vsel %vm877_vm2, %v3614_v43, %v2370_v9  ;;  %v2412_v5 = vld [vmem:[%s2569_s9 + $0x168] sm:$0xff]  ;;  %v4426_v9 = vld [vmem:[#allocation35_spill] sm:$0xff] }
  0xf9   : > { %v3629_v55 = vsel %vm877_vm2, %v2412_v5, %v2365_v58  ;;  %v2415_v5 = vld [vmem:[%s2569_s9 + $0x170] sm:$0xff] }
  0xfa   : > { %v3618_v22 = vsel %vm877_vm2, %v2411_v18, %v2369_v59  ;;  %4425 = vst [vmem:[#allocation51_spill] sm:$0xff] %v3629_v55  ;;  %v2374_v59 = vunpack.i.l.bf16 %v3385_v61  ;;  %v2414_v18 = vld [vmem:[%s2569_s9 + $0xa8] sm:$0xff] }
  0xfb   : > { %v688_v19 = vpop.permute.xlu0 %687  ;;  %v3643_v54 = vsel %vm877_vm2, %v2414_v18, %v2375_v10  ;;  %v4428_v10 = vld [vmem:[#allocation36_spill] sm:$0xff] }
  0xfd   : > { %1262 = vmatmul.f32.gmra.mxu1 %v915_v27  ;;  %v3622_v27 = vpop.permute.xlu2 %783 }
  0xff   : > { %1170 = vmatmul.f32.gmra.mxu0 %v3594_v45  ;;  %1221 = vmatmul.f32.gmra.mxu2 %v3598_v23 }
 0x100   : > { %1334 = vmatmul.f32.gmra.mxu3 %v939_v14  ;;  %v485_v14 = vrot.slane %v2413_v12, 2  ;;  %v3647_v12 = vsel %vm877_vm2, %v2415_v5, %v2374_v59 }
 0x101   : > { %4427 = vst [vmem:[#allocation35_spill] sm:$0xff] %v3647_v12 }
 0x102   : > { %v3639_v58 = vsel %vm406_vm1, %v483_v28, %v485_v14  ;;  %v2380_v14 = vunpack.i.h.bf16 %v3438_v44 }
 0x103   : > { %v941_v61 = vsel %vm877_vm2, %v3639_v58, %v3399_v24  ;;  %v4429_v24 = vld [vmem:[#allocation8_spill] sm:$0xff] }
 0x105   : > { %1265 = vmatmul.f32.gmra.mxu1 %v916_v39  ;;  %v917_v39 = vsel %vm877_vm2, %v4426_v9, %v688_v19  ;;  %v690_v28 = vpop.permute.xlu2 %689  ;;  %v2379_v19 = vunpack.i.l.bf16 %v3438_v44  ;;  %v3675_v44 = vld [vmem:[%s4287_s2] ss:$0 sm:$0xff] }
 0x106   : > { %v918_v59 = vsel %vm877_vm2, %v4428_v10, %v690_v28 }
 0x107   : > { %1173 = vmatmul.f32.gmra.mxu0 %v3618_v22  ;;  %1224 = vmatmul.f32.gmra.mxu2 %v3629_v55  ;;  %v942_v5 = vsel %vm877_vm2, %v4429_v24, %v2379_v19  ;;  %v3666_v55 = vpop.permute.xlu0 %787  ;;  %v4430_v19 = vld [vmem:[#allocation39_spill] sm:$0xff] }
 0x108   : > { %1337 = vmatmul.f32.gmra.mxu3 %v940_v26  ;;  %v3652_v26 = vpop.permute.xlu1 %785 }
 0x10d   : > { %1268 = vmatmul.f32.gmra.mxu1 %v917_v39  ;;  %v2416_v39 = vld [vmem:[%s2569_s9 + $0xb0] sm:$0xff]  ;;  %v3688_v23 = vpop.permute.xlu2 %789 }
 0x10e   : > { %v3662_v18 = vsel %vm877_vm2, %v2416_v39, %v2380_v14 }
 0x10f   : > { %1176 = vmatmul.f32.gmra.mxu0 %v3643_v54  ;;  %1227 = vmatmul.f32.gmra.mxu2 %v3647_v12  ;;  %v1721_v12 = vld [vmem:[%s4288_s3 + $0x30] sm:$0xff] }
 0x110   : > { %1340 = vmatmul.f32.gmra.mxu3 %v941_v61  ;;  %1832 = vmatpush.msrb.mxu1 %v1721_v12  ;;  %v692_v61 = vpop.permute.xlu1 %691  ;;  %v4431_v12 = vld [vmem:[#allocation12_spill] sm:$0xff] }
 0x115   : > { %1271 = vmatmul.f32.gmra.mxu1 %v918_v59  ;;  %v919_v59 = vsel %vm877_vm2, %v4430_v19, %v692_v61 }
 0x117   : > { %1179 = vmatmul.f32.gmra.mxu0 %v3662_v18  ;;  %1360 = vmatmul.f32.vlgmr.msrb.gmra.mxu2 %v942_v5  ;;  %v943_v5 = vsel %vm877_vm2, %v4431_v12, %v3449_v47 }
 0x118   : > { %1473 = vmatmul.f32.vlgmr.msrb.gmra.mxu3 %v3311_v60  ;;  %v694_v60 = vpop.permute.xlu0 %693 }
 0x11a   : > { %v1183_v28 = vpop.f32.mrf.mxu2  ;;  %v1296_v14 = vpop.f32.mrf.mxu3 }
 0x11b   : > { %v1184_v39 = vadd.f32 %v3675_v44, %v1183_v28  ;;  %v4432_v28 = vld [vmem:[#allocation37_spill] sm:$0xff] }
 0x11c   : > { %v3681_v24 = vpop.f32.mrf.mxu0  ;;  %v920_v49 = vsel %vm877_vm2, %v4432_v28, %v694_v60 }
 0x11d   : > { %v3686_v8 = vadd.f32 %v1296_v14, %v1184_v39  ;;  %1274 = vmatmul.f32.gmra.mxu1 %v919_v59  ;;  %v4433_v14 = vld [vmem:[#allocation10_spill] sm:$0xff] }
 0x11e   : > { %v944_v59 = vsel %vm877_vm2, %v4433_v14, %v3487_v37  ;;  %v4436_v14 = vld [vmem:[#allocation16_spill] sm:$0xff] }
 0x11f   : > { %1363 = vmatmul.f32.gmra.mxu2 %v943_v5  ;;  %2116 = vmatmul.msk.f32.vlgmr.msrb.gmra.mxu0 %vm877_vm2, %v2998_v40  ;;  %v3703_v40 = vpop.permute.xlu1 %791  ;;  %v696_v5 = vpop.permute.xlu2 %695 }
 0x120   : > { %1476 = vmatmul.f32.gmra.mxu3 %v3362_v33  ;;  %v1720_v33 = vld [vmem:[%s4288_s3 + $0x28] sm:$0xff] }
 0x121   : > { %1833 = vmatpush.msrb.mxu1 %v1720_v33  ;;  %v945_v33 = vsel %vm877_vm2, %v4436_v14, %v3518_v25 }
 0x122   : > { %v1186_v61 = vpop.f32.mrf.mxu2 }
 0x123   : > { %v1187_v52 = vadd.f32 %v3675_v44, %v1186_v61  ;;  %v1299_v15 = vpop.f32.mrf.mxu3  ;;  %v4435_v61 = vld [vmem:[#allocation38_spill] sm:$0xff] }
 0x124   : > { %v3696_v47 = vpop.f32.mrf.mxu0  ;;  %v921_v37 = vsel %vm877_vm2, %v4435_v61, %v696_v5 }
 0x125   : > { %v3701_v39 = vadd.f32 %v1299_v15, %v1187_v52  ;;  %1277 = vmatmul.f32.gmra.mxu1 %v920_v49 }
 0x127   : > { %4434 = vst [vmem:[#allocation36_spill] sm:$0xff] %v3701_v39  ;;  %1366 = vmatmul.f32.gmra.mxu2 %v944_v59  ;;  %2117 = vmatmul.msk.f32.gmra.mxu0 %vm877_vm2, %v3029_v35  ;;  %v3721_v35 = vpop.permute.xlu0 %793 }
 0x128   : > { %1479 = vmatmul.f32.gmra.mxu3 %v3407_v31  ;;  %v698_v31 = vpop.permute.xlu1 %697 }
 0x12a   : > { %v1189_v60 = vpop.f32.mrf.mxu2 }
 0x12b   : > { %v1190_v49 = vadd.f32 %v3675_v44, %v1189_v60  ;;  %v1302_v15 = vpop.f32.mrf.mxu3  ;;  %v922_v60 = vsel %vm877_vm2, %v3224_v0, %v698_v31 }
 0x12c   : > { %v3714_v52 = vpop.f32.mrf.mxu0 }
 0x12d   : > { %v3719_v59 = vadd.f32 %v1302_v15, %v1190_v49  ;;  %1280 = vmatmul.f32.gmra.mxu1 %v921_v37  ;;  %v4437_v37 = vld [vmem:[#allocation14_spill] sm:$0xff] }
 0x12e   : > { %v946_v49 = vsel %vm877_vm2, %v4437_v37, %v3555_v62  ;;  %v4440_v37 = vld [vmem:[#allocation20_spill] sm:$0xff] }
 0x12f   : > { %1369 = vmatmul.f32.gmra.mxu2 %v945_v33  ;;  %2118 = vmatmul.msk.f32.gmra.mxu0 %vm877_vm2, %v3064_v41  ;;  %v3736_v41 = vpop.permute.xlu2 %795  ;;  %v700_v33 = vpop.permute.xlu0 %699 }
 0x130   : > { %1482 = vmatmul.f32.gmra.mxu3 %v3443_v6  ;;  %v1719_v6 = vld [vmem:[%s4288_s3 + $0x20] sm:$0xff] }
 0x131   : > { %1834 = vmatpush.msrb.mxu1 %v1719_v6  ;;  %v947_v6 = vsel %vm877_vm2, %v4440_v37, %v3579_v56 }
 0x132   : > { %v1192_v5 = vpop.f32.mrf.mxu2 }
 0x133   : > { %v1193_v12 = vadd.f32 %v3675_v44, %v1192_v5  ;;  %v1305_v39 = vpop.f32.mrf.mxu3  ;;  %v4439_v5 = vld [vmem:[#allocation41_spill] sm:$0xff] }
 0x134   : > { %v3729_v25 = vpop.f32.mrf.mxu0  ;;  %v923_v62 = vsel %vm877_vm2, %v4439_v5, %v700_v33 }
 0x135   : > { %v3734_v15 = vadd.f32 %v1305_v39, %v1193_v12  ;;  %1283 = vmatmul.f32.gmra.mxu1 %v922_v60 }
 0x137   : > { %4438 = vst [vmem:[#allocation39_spill] sm:$0xff] %v3734_v15  ;;  %1372 = vmatmul.f32.gmra.mxu2 %v946_v49  ;;  %2119 = vmatmul.msk.f32.gmra.mxu0 %vm877_vm2, %v4426_v9  ;;  %v3754_v9 = vpop.permute.xlu1 %797 }
 0x138   : > { %1485 = vmatmul.f32.gmra.mxu3 %v3478_v7  ;;  %v702_v7 = vpop.permute.xlu2 %701 }
 0x13a   : > { %v1195_v31 = vpop.f32.mrf.mxu2 }
 0x13b   : > { %v1196_v12 = vadd.f32 %v3675_v44, %v1195_v31  ;;  %v1308_v39 = vpop.f32.mrf.mxu3  ;;  %v924_v31 = vsel %vm877_vm2, %v3192_v4, %v702_v7 }
 0x13c   : > { %v3747_v60 = vpop.f32.mrf.mxu0 }
 0x13d   : > { %v3752_v49 = vadd.f32 %v1308_v39, %v1196_v12  ;;  %1286 = vmatmul.f32.gmra.mxu1 %v923_v62  ;;  %v4441_v62 = vld [vmem:[#allocation18_spill] sm:$0xff] }
 0x13e   : > { %v948_v12 = vsel %vm877_vm2, %v4441_v62, %v3602_v20 }
 0x13f   : > { %1375 = vmatmul.f32.gmra.mxu2 %v947_v6  ;;  %2120 = vmatmul.msk.f32.gmra.mxu0 %vm877_vm2, %v4428_v10  ;;  %v704_v10 = vpop.permute.xlu1 %703 }
 0x140   : > { %1488 = vmatmul.f32.gmra.mxu3 %v3514_v48  ;;  %v1718_v48 = vld [vmem:[%s4288_s3 + $0x18] sm:$0xff]  ;;  %v925_v7 = vsel %vm877_vm2, %v3341_v38, %v704_v10 }
 0x141   : > { %1835 = vmatpush.msrb.mxu1 %v1718_v48 }
 0x142   : > { %v1198_v33 = vpop.f32.mrf.mxu2 }
 0x143   : > { %v1199_v14 = vadd.f32 %v3675_v44, %v1198_v33  ;;  %v1311_v15 = vpop.f32.mrf.mxu3  ;;  %v4442_v33 = vld [vmem:[#allocation24_spill] sm:$0xff] }
 0x144   : > { %v3762_v56 = vpop.f32.mrf.mxu0 }
 0x145   : > { %v3767_v39 = vadd.f32 %v1311_v15, %v1199_v14  ;;  %1289 = vmatmul.f32.gmra.mxu1 %v924_v31  ;;  %v949_v31 = vsel %vm877_vm2, %v4442_v33, %v3622_v27 }
 0x147   : > { %1378 = vmatmul.f32.gmra.mxu2 %v948_v12  ;;  %2121 = vmatmul.msk.f32.gmra.mxu0 %vm877_vm2, %v4430_v19 }
 0x148   : > { %1491 = vmatmul.f32.gmra.mxu3 %v3547_v21 }
 0x14a   : > { %v1201_v6 = vpop.f32.mrf.mxu2 }
 0x14b   : > { %v1202_v20 = vadd.f32 %v3675_v44, %v1201_v6  ;;  %v1314_v14 = vpop.f32.mrf.mxu3  ;;  %v4444_v6 = vld [vmem:[#allocation22_spill] sm:$0xff] }
 0x14c   : > { %v3778_v15 = vpop.f32.mrf.mxu0  ;;  %v950_v62 = vsel %vm877_vm2, %v4444_v6, %v3652_v26 }
 0x14d   : > { %v3783_v12 = vadd.f32 %v1314_v14, %v1202_v20  ;;  %1292 = vmatmul.f32.gmra.mxu1 %v925_v7  ;;  %v1717_v7 = vld [vmem:[%s4288_s3 + $0x10] sm:$0xff]  ;;  %v4446_v14 = vld [vmem:[#allocation28_spill] sm:$0xff] }
 0x14e   : > { %1836 = vmatpush.msrb.mxu1 %v1717_v7 }
 0x14f   : > { %4443 = vst [vmem:[#allocation37_spill] sm:$0xff] %v3783_v12  ;;  %1381 = vmatmul.f32.gmra.mxu2 %v949_v31  ;;  %2122 = vmatmul.msk.f32.gmra.mxu0 %vm877_vm2, %v4432_v28  ;;  %v951_v31 = vsel %vm877_vm2, %v4446_v14, %v3666_v55  ;;  %v4448_v55 = vld [vmem:[#allocation26_spill] sm:$0xff] }
 0x150   : > { %1494 = vmatmul.f32.gmra.mxu3 %v3575_v50 }
 0x152   : > { %v1204_v21 = vpop.f32.mrf.mxu2 }
 0x153   : > { %v1205_v19 = vadd.f32 %v3675_v44, %v1204_v21  ;;  %v1317_v48 = vpop.f32.mrf.mxu3 }
 0x154   : > { %v3789_v10 = vpop.f32.mrf.mxu0 }
 0x155   : > { %v3794_v27 = vadd.f32 %v1317_v48, %v1205_v19 }
 0x157   : > { %4445 = vst [vmem:[#allocation38_spill] sm:$0xff] %v3794_v27  ;;  %1384 = vmatmul.f32.gmra.mxu2 %v950_v62  ;;  %2123 = vmatmul.msk.f32.gmra.mxu0 %vm877_vm2, %v4435_v61  ;;  %v3814_v61 = vld [vmem:[%s2569_s9 + $0x188] sm:$0xff] }
 0x158   : > { %1497 = vmatmul.f32.gmra.mxu3 %v3594_v45  ;;  %v523_v62 = vrot.slane %v3814_v61, 1  ;;  %v4459_v27 = vld [vmem:[#allocation6_spill] sm:$0xff] }
 0x15a   : > { %v1207_v50 = vpop.f32.mrf.mxu2 }
 0x15b   : > { %v1208_v28 = vadd.f32 %v3675_v44, %v1207_v50  ;;  %v1320_v20 = vpop.f32.mrf.mxu3  ;;  %v952_v50 = vsel %vm877_vm2, %v4448_v55, %v3688_v23  ;;  %v3849_v55 = vld [vmem:[%s2569_s9 + $0x198] sm:$0xff] }
 0x15c   : > { %v3803_v26 = vpop.f32.mrf.mxu0 }
 0x15d   : > { %v3808_v21 = vadd.f32 %v1320_v20, %v1208_v28  ;;  %v3824_v28 = vld [vmem:[%s2569_s9 + $0x190] sm:$0x3] }
 0x15f   : > { %4447 = vst [vmem:[#allocation41_spill] sm:$0xff] %v3808_v21  ;;  %1387 = vmatmul.f32.gmra.mxu2 %v951_v31  ;;  %2124 = vmatmul.msk.f32.gmra.mxu0 %vm877_vm2, %v3224_v0  ;;  %v1716_v0 = vld [vmem:[%s4288_s3 + $0x8] sm:$0xff] }
 0x160   : > { %1500 = vmatmul.f32.gmra.mxu3 %v3618_v22  ;;  %v525_v22 = vrot.slane %v3824_v28, 1  ;;  %1837 = vmatpush.msrb.mxu1 %v1716_v0 }
 0x162   : > { %v1210_v45 = vpop.f32.mrf.mxu2  ;;  %v3835_v23 = vsel %vm325_vm0, %v523_v62, %v525_v22 }
 0x163   : > { %v1211_v19 = vadd.f32 %v3675_v44, %v1210_v45  ;;  %v1323_v48 = vpop.f32.mrf.mxu3  ;;  %v2386_v31 = vpack.i.bf16 %v3835_v23, %v3639_v58 }
 0x164   : > { %v3818_v7 = vpop.f32.mrf.mxu0 }
 0x165   : > { %v3826_v20 = vadd.f32 %v1323_v48, %v1211_v19  ;;  %2387 = vrot.lane.b32.xlu0 %v2386_v31, %s2483_s10  ;;  %v567_v19 = vrot.slane %v3849_v55, 1 }
 0x167   : > { %4449 = vst [vmem:[#allocation20_spill] sm:$0xff] %v3826_v20  ;;  %1390 = vmatmul.f32.gmra.mxu2 %v952_v50  ;;  %2125 = vmatmul.msk.f32.gmra.mxu0 %vm877_vm2, %v4439_v5  ;;  %v4450_v5 = vld [vmem:[#allocation32_spill] sm:$0xff]  ;;  %v3857_v20 = vld [vmem:[%s2569_s9 + $0x180] sm:$0xff] }
 0x168   : > { %1503 = vmatmul.f32.gmra.mxu3 %v3643_v54  ;;  %v953_v22 = vsel %vm877_vm2, %v4450_v5, %v3703_v40  ;;  %v3852_v54 = vld [vmem:[%s2569_s9 + $0x1a0] sm:$0xff]  ;;  %v559_v31 = vrot.slane %v3857_v20, 2  ;;  %v4452_v40 = vrot.slane %v3814_v61, 2 }
 0x16a   : > { %v1213_v45 = vpop.f32.mrf.mxu2  ;;  %v3867_v5 = vsel %vm406_vm1, %v559_v31, %v4452_v40  ;;  %v1248_v40 = vpop.f32.mrf.mxu1 }
 0x16b   : > { %v1214_v48 = vadd.f32 %v3675_v44, %v1213_v45  ;;  %v1326_v0 = vpop.f32.mrf.mxu3  ;;  %v568_v45 = vrot.slane %v3852_v54, 1 }
 0x16c   : > { %v3843_v50 = vpop.f32.mrf.mxu0 }
 0x16d   : > { %v3854_v14 = vadd.f32 %v1326_v0, %v1214_v48  ;;  %v569_v48 = vsel %vm325_vm0, %v567_v19, %v568_v45  ;;  %v522_v19 = vrot.slane %v3857_v20, 1 }
 0x16e   : > { %v2391_v0 = vpack.i.bf16 %v569_v48, %v3867_v5  ;;  %v4455_v48 = vld [vmem:[#allocation40_spill] sm:$0xff] }
 0x16f   : > { %4451 = vst [vmem:[#allocation52_spill] sm:$0xff] %v3854_v14  ;;  %1393 = vmatmul.f32.gmra.mxu2 %v953_v22  ;;  %2126 = vmatmul.msk.f32.gmra.mxu0 %vm877_vm2, %v3192_v4  ;;  %v4453_v4 = vld [vmem:[#allocation30_spill] sm:$0xff] }
 0x170   : > { %1506 = vmatmul.f32.gmra.mxu3 %v3662_v18  ;;  %2392 = vrot.lane.b32.xlu1 %v2391_v0, %s2483_s10  ;;  %v954_v33 = vsel %vm877_vm2, %v4453_v4, %v3721_v35  ;;  %v1715_v18 = vld [vmem:[%s4288_s3] sm:$0xff] }
 0x171   : > { %1838 = vmatpush.msrb.mxu1 %v1715_v18 }
 0x172   : > { %v1216_v14 = vpop.f32.mrf.mxu2 }
 0x173   : > { %v1217_v6 = vadd.f32 %v3675_v44, %v1216_v14  ;;  %v1329_v21 = vpop.f32.mrf.mxu3  ;;  %v3888_v14 = vsel %vm325_vm0, %v522_v19, %v523_v62  ;;  %v4458_v19 = vld [vmem:[#allocation42_spill] sm:$0xff] }
 0x174   : > { %v3874_v22 = vpop.f32.mrf.mxu0  ;;  %v2381_v35 = vpack.i.bf16 %v3888_v14, %v3614_v43 }
 0x175   : > { %v3879_v31 = vadd.f32 %v1329_v21, %v1217_v6 }
 0x176   : > { %2382 = vrot.lane.b32.xlu2 %v2381_v35, %s2483_s10 }
 0x177   : > { %4454 = vst [vmem:[#allocation53_spill] sm:$0xff] %v3879_v31  ;;  %1396 = vmatmul.f32.gmra.mxu2 %v954_v33  ;;  %2127 = vmatmul.msk.f32.gmra.mxu0 %vm877_vm2, %v3341_v38  ;;  %v4456_v33 = vld [vmem:[#allocation34_spill] sm:$0xff] }
 0x178   : > { %1509 = vmatmul.f32.gmra.mxu3 %v4455_v48  ;;  %v955_v38 = vsel %vm877_vm2, %v4456_v33, %v3736_v41  ;;  %v1251_v48 = vpop.f32.mrf.mxu1  ;;  %v956_v41 = vsel %vm877_vm2, %v4459_v27, %v3754_v9  ;;  %v3922_v9 = vld [vmem:[%s2569_s9 + $0x1a8] sm:$0x3] }
 0x17a   : > { %v1219_v6 = vpop.f32.mrf.mxu2 }
 0x17b   : > { %v1220_v21 = vadd.f32 %v3675_v44, %v1219_v6  ;;  %v1332_v0 = vpop.f32.mrf.mxu3 }
 0x17c   : > { %v3895_v18 = vpop.f32.mrf.mxu0 }
 0x17d   : > { %v3900_v62 = vadd.f32 %v1332_v0, %v1220_v21 }
 0x17f   : > { %4457 = vst [vmem:[#allocation40_spill] sm:$0xff] %v3900_v62  ;;  %1399 = vmatmul.f32.gmra.mxu2 %v955_v38  ;;  %2128 = vmatmul.msk.f32.gmra.mxu0 %vm877_vm2, %v3133_v57  ;;  %v800_v57 = vpop.permute.xlu0 %799  ;;  %v4461_v62 = vld [vmem:[#allocation7_spill] sm:$0xff] }
 0x180   : > { %1512 = vmatmul.f32.gmra.mxu3 %v4458_v19  ;;  %v1254_v19 = vpop.f32.mrf.mxu1  ;;  %v957_v12 = vsel %vm877_vm2, %v4461_v62, %v800_v57 }
 0x182   : > { %v1222_v4 = vpop.f32.mrf.mxu2 }
 0x183   : > { %v1223_v35 = vadd.f32 %v3675_v44, %v1222_v4  ;;  %v1335_v6 = vpop.f32.mrf.mxu3 }
 0x184   : > { %v3906_v31 = vpop.f32.mrf.mxu0 }
 0x185   : > { %v3911_v21 = vadd.f32 %v1335_v6, %v1223_v35  ;;  %v562_v6 = vrot.slane %v3824_v28, 2 }
 0x187   : > { %4460 = vst [vmem:[#allocation42_spill] sm:$0xff] %v3911_v21  ;;  %1402 = vmatmul.f32.gmra.mxu2 %v956_v41  ;;  %2129 = vmatmul.msk.f32.gmra.mxu0 %vm877_vm2, %v3161_v3  ;;  %v570_v3 = vrot.slane %v3922_v9, 1  ;;  %v4465_v21 = vld [vmem:[#allocation9_spill] sm:$0xff] }
 0x188   : > { %1515 = vmatmul.f32.gmra.mxu3 %v3211_v46  ;;  %v4463_v46 = vrot.slane %v3814_v61, 2 }
 0x18a   : > { %v1225_v0 = vpop.f32.mrf.mxu2  ;;  %v3933_v41 = vsel %vm406_vm1, %v4463_v46, %v562_v6  ;;  %v1257_v46 = vpop.f32.mrf.mxu1 }
 0x18b   : > { %v1226_v38 = vadd.f32 %v3675_v44, %v1225_v0  ;;  %v1338_v4 = vpop.f32.mrf.mxu3  ;;  %v571_v0 = vsel %vm325_vm0, %v568_v45, %v570_v3  ;;  %v804_v3 = vpop.permute.xlu0 %803 }
 0x18c   : > { %v3917_v33 = vpop.f32.mrf.mxu0  ;;  %v2396_v57 = vpack.i.bf16 %v571_v0, %v3933_v41 }
 0x18d   : > { %v3924_v35 = vadd.f32 %v1338_v4, %v1226_v38  ;;  %v802_v38 = vpop.permute.xlu2 %801 }
 0x18e   : > { %2397 = vrot.lane.b32.xlu2 %v2396_v57, %s2483_s10 }
 0x18f   : > { %4462 = vst [vmem:[#allocation54_spill] sm:$0xff] %v3924_v35  ;;  %1405 = vmatmul.f32.gmra.mxu2 %v957_v12  ;;  %2130 = vmatmul.msk.f32.gmra.mxu0 %vm877_vm2, %v3197_v42  ;;  %v4464_v42 = vld [vmem:[#allocation5_spill] sm:$0xff] }
 0x190   : > { %1518 = vmatmul.f32.gmra.mxu3 %v3249_v63  ;;  %v958_v27 = vsel %vm877_vm2, %v4464_v42, %v802_v38  ;;  %v1136_v63 = vadd.f32 %v3675_v44, %v3681_v24  ;;  %v959_v38 = vsel %vm877_vm2, %v4465_v21, %v804_v3 }
 0x192   : > { %v1228_v4 = vpop.f32.mrf.mxu2  ;;  %v1249_v45 = vadd.f32 %v1248_v40, %v1136_v63  ;;  %v806_v40 = vpop.permute.xlu1 %805 }
 0x193   : > { %v1229_v12 = vadd.f32 %v3675_v44, %v1228_v4  ;;  %v1341_v28 = vpop.f32.mrf.mxu3 }
 0x194   : > { %v3940_v62 = vpop.f32.mrf.mxu0 }
 0x195   : > { %v3944_v6 = vadd.f32 %v1341_v28, %v1229_v12  ;;  %v1139_v28 = vadd.f32 %v3675_v44, %v3696_v47 }
 0x197   : > { %1408 = vmatmul.f32.gmra.mxu2 %v958_v27  ;;  %2131 = vmatmul.msk.f32.gmra.mxu0 %vm877_vm2, %v3231_v51  ;;  %v1260_v51 = vpop.f32.mrf.mxu1 }
 0x198   : > { %1521 = vmatmul.f32.gmra.mxu3 %v3283_v13  ;;  %v1252_v13 = vadd.f32 %v1251_v48, %v1139_v28 }
 0x19a   : > { %v1361_v0 = vpop.f32.mrf.mxu2 }
 0x19b   : > { %v1362_v57 = vadd.f32 %v1361_v0, %v1249_v45  ;;  %v1474_v4 = vpop.f32.mrf.mxu3 }
 0x19c   : > { %v1587_v35 = vpop.f32.mrf.mxu0 }
 0x19d   : > { %v1475_v12 = vadd.f32 %v1474_v4, %v1362_v57  ;;  %v4466_v57 = vld [vmem:[#allocation13_spill] sm:$0xff]  ;;  %v1142_v4 = vadd.f32 %v3675_v44, %v3714_v52 }
 0x19e   : > { %v960_v47 = vsel %vm877_vm2, %v4466_v57, %v806_v40  ;;  %v4467_v40 = vld [vmem:[#allocation11_spill] sm:$0xff] }
 0x19f   : > { %v1588_v24 = vadd.f32 %v1587_v35, %v1475_v12  ;;  %1411 = vmatmul.f32.gmra.mxu2 %v959_v38  ;;  %2132 = vmatmul.msk.f32.gmra.mxu0 %vm877_vm2, %v3267_v30  ;;  %v808_v38 = vpop.permute.xlu2 %807  ;;  %v1263_v12 = vpop.f32.mrf.mxu1 }
 0x1a0   : > { %1524 = vmatmul.f32.gmra.mxu3 %v3315_v1  ;;  %v1255_v1 = vadd.f32 %v1254_v19, %v1142_v4  ;;  %v961_v52 = vsel %vm877_vm2, %v4467_v40, %v808_v38  ;;  %v4469_v19 = vld [vmem:[#allocation45_spill] sm:$0xff] }
 0x1a1   : > { %v1683_v27 = vmax.f32 %v1588_v24, 0.0  ;;  %v4470_v38 = vld [vmem:[#allocation17_spill] sm:$0xff] }
 0x1a2   : > { %v1364_v63 = vpop.f32.mrf.mxu2 }
 0x1a3   : > { %v1365_v45 = vadd.f32 %v1364_v63, %v1252_v13  ;;  %v1477_v0 = vpop.f32.mrf.mxu3  ;;  %2148 = vmatmul.msk.f32.vlgmr.msrb.gmra.mxu1 %vm877_vm2, %v1683_v27 }
 0x1a4   : > { %v1590_v3 = vpop.f32.mrf.mxu0 }
 0x1a5   : > { %v1478_v35 = vadd.f32 %v1477_v0, %v1365_v45  ;;  %v1145_v45 = vadd.f32 %v3675_v44, %v3729_v25 }
 0x1a7   : > { %v1591_v30 = vadd.f32 %v1590_v3, %v1478_v35  ;;  %1414 = vmatmul.f32.gmra.mxu2 %v960_v47  ;;  %2133 = vmatmul.msk.f32.gmra.mxu0 %vm877_vm2, %v3301_v11  ;;  %v1258_v0 = vadd.f32 %v1257_v46, %v1145_v45  ;;  %v810_v47 = vpop.permute.xlu0 %809 }
 0x1a8   : > { %1527 = vmatmul.f32.gmra.mxu3 %v3368_v16  ;;  %v4468_v16 = vld [vmem:[#allocation43_spill] sm:$0xff]  ;;  %v962_v25 = vsel %vm877_vm2, %v4470_v38, %v810_v47 }
 0x1a9   : > { %v1684_v48 = vmax.f32 %v1591_v30, 0.0 }
 0x1aa   : > { %v1367_v28 = vpop.f32.mrf.mxu2 }
 0x1ab   : > { %v1368_v24 = vadd.f32 %v1367_v28, %v1255_v1  ;;  %v1480_v13 = vpop.f32.mrf.mxu3  ;;  %2149 = vmatmul.msk.f32.gmra.mxu1 %vm877_vm2, %v1684_v48  ;;  %v1266_v1 = vpop.f32.mrf.mxu1 }
 0x1ac   : > { %v1593_v27 = vpop.f32.mrf.mxu0 }
 0x1ad   : > { %v1481_v63 = vadd.f32 %v1480_v13, %v1368_v24  ;;  %v1148_v24 = vadd.f32 %v3675_v44, %v3747_v60 }
 0x1af   : > { %v1594_v11 = vadd.f32 %v1593_v27, %v1481_v63  ;;  %1417 = vmatmul.f32.gmra.mxu2 %v961_v52  ;;  %2134 = vmatmul.msk.f32.gmra.mxu0 %vm877_vm2, %v4468_v16  ;;  %v4471_v27 = vld [vmem:[#allocation44_spill] sm:$0xff]  ;;  %v1261_v46 = vadd.f32 %v1260_v51, %v1148_v24  ;;  %v812_v63 = vpop.permute.xlu1 %811 }
 0x1b0   : > { %1530 = vmatmul.f32.gmra.mxu3 %v4469_v19 }
 0x1b1   : > { %v1685_v3 = vmax.f32 %v1594_v11, 0.0 }
 0x1b2   : > { %v1370_v35 = vpop.f32.mrf.mxu2 }
 0x1b3   : > { %v1371_v4 = vadd.f32 %v1370_v35, %v1258_v0  ;;  %v1483_v30 = vpop.f32.mrf.mxu3  ;;  %2150 = vmatmul.msk.f32.gmra.mxu1 %vm877_vm2, %v1685_v3  ;;  %v4472_v0 = vld [vmem:[#allocation15_spill] sm:$0xff]  ;;  %v1269_v47 = vpop.f32.mrf.mxu1  ;;  %v1151_v35 = vadd.f32 %v3675_v44, %v3762_v56 }
 0x1b4   : > { %v1596_v48 = vpop.f32.mrf.mxu0  ;;  %v963_v3 = vsel %vm877_vm2, %v4472_v0, %v812_v63  ;;  %v816_v63 = vpop.permute.xlu0 %815 }
 0x1b5   : > { %v1484_v28 = vadd.f32 %v1483_v30, %v1371_v4  ;;  %v814_v30 = vpop.permute.xlu2 %813 }
 0x1b7   : > { %v1597_v13 = vadd.f32 %v1596_v48, %v1484_v28  ;;  %1420 = vmatmul.f32.gmra.mxu2 %v962_v25  ;;  %2135 = vmatmul.msk.f32.gmra.mxu0 %vm877_vm2, %v4471_v27 }
 0x1b8   : > { %1533 = vmatmul.f32.gmra.mxu3 %v3454_v29  ;;  %v1264_v29 = vadd.f32 %v1263_v12, %v1151_v35  ;;  %v1157_v35 = vadd.f32 %v3675_v44, %v3789_v10 }
 0x1b9   : > { %v1686_v52 = vmax.f32 %v1597_v13, 0.0  ;;  %v4473_v13 = vld [vmem:[#allocation21_spill] sm:$0xff] }
 0x1ba   : > { %v1373_v45 = vpop.f32.mrf.mxu2  ;;  %v964_v27 = vsel %vm877_vm2, %v4473_v13, %v814_v30 }
 0x1bb   : > { %v1374_v11 = vadd.f32 %v1373_v45, %v1261_v46  ;;  %v1486_v16 = vpop.f32.mrf.mxu3  ;;  %2151 = vmatmul.msk.f32.gmra.mxu1 %vm877_vm2, %v1686_v52  ;;  %v1154_v46 = vadd.f32 %v3675_v44, %v3778_v15 }
 0x1bc   : > { %v1599_v19 = vpop.f32.mrf.mxu0 }
 0x1bd   : > { %v1487_v60 = vadd.f32 %v1486_v16, %v1374_v11 }
 0x1bf   : > { %v1600_v4 = vadd.f32 %v1599_v19, %v1487_v60  ;;  %1423 = vmatmul.f32.gmra.mxu2 %v963_v3  ;;  %2136 = vmatmul.msk.f32.gmra.mxu0 %vm877_vm2, %v3434_v17  ;;  %v1272_v17 = vpop.f32.mrf.mxu1  ;;  %v4474_v3 = vld [vmem:[#allocation19_spill] sm:$0xff] }
 0x1c0   : > { %1536 = vmatmul.f32.gmra.mxu3 %v3482_v2  ;;  %v1267_v2 = vadd.f32 %v1266_v1, %v1154_v46  ;;  %v965_v15 = vsel %vm877_vm2, %v4474_v3, %v816_v63 }
 0x1c1   : > { %v1687_v51 = vmax.f32 %v1600_v4, 0.0  ;;  %v818_v4 = vpop.permute.xlu1 %817 }
 0x1c2   : > { %v1376_v48 = vpop.f32.mrf.mxu2 }
 0x1c3   : > { %v1377_v25 = vadd.f32 %v1376_v48, %v1264_v29  ;;  %v1489_v28 = vpop.f32.mrf.mxu3  ;;  %2152 = vmatmul.msk.f32.gmra.mxu1 %vm877_vm2, %v1687_v51 }
 0x1c4   : > { %v1602_v24 = vpop.f32.mrf.mxu0 }
 0x1c5   : > { %v1490_v56 = vadd.f32 %v1489_v28, %v1377_v25  ;;  %v4475_v28 = vld [vmem:[#allocation25_spill] sm:$0xff] }
 0x1c6   : > { %v966_v10 = vsel %vm877_vm2, %v4475_v28, %v818_v4 }
 0x1c7   : > { %v1603_v52 = vadd.f32 %v1602_v24, %v1490_v56  ;;  %1426 = vmatmul.f32.gmra.mxu2 %v964_v27  ;;  %2137 = vmatmul.msk.f32.gmra.mxu0 %vm877_vm2, %v3388_v32  ;;  %v1275_v29 = vpop.f32.mrf.mxu1  ;;  %v1160_v27 = vadd.f32 %v3675_v44, %v3803_v26 }
 0x1c8   : > { %1539 = vmatmul.f32.gmra.mxu3 %v3523_v34  ;;  %v1270_v34 = vadd.f32 %v1269_v47, %v1157_v35  ;;  %v4477_v47 = vld [vmem:[#allocation49_spill] sm:$0xff]  ;;  %v4479_v35 = vld [vmem:[#allocation46_spill] sm:$0xff] }
 0x1c9   : > { %v1688_v12 = vmax.f32 %v1603_v52, 0.0  ;;  %v1273_v56 = vadd.f32 %v1272_v17, %v1160_v27  ;;  %v820_v52 = vpop.permute.xlu2 %819  ;;  %v4480_v17 = vld [vmem:[#allocation50_spill] sm:$0xff]  ;;  %v1166_v27 = vadd.f32 %v3675_v44, %v3843_v50 }
 0x1ca   : > { %v1379_v45 = vpop.f32.mrf.mxu2 }
 0x1cb   : > { %v1380_v11 = vadd.f32 %v1379_v45, %v1267_v2  ;;  %v1492_v16 = vpop.f32.mrf.mxu3  ;;  %2153 = vmatmul.msk.f32.gmra.mxu1 %vm877_vm2, %v1688_v12 }
 0x1cc   : > { %v1605_v19 = vpop.f32.mrf.mxu0 }
 0x1cd   : > { %v1493_v60 = vadd.f32 %v1492_v16, %v1380_v11  ;;  %v4478_v16 = vld [vmem:[#allocation23_spill] sm:$0xff] }
 0x1ce   : > { %v967_v26 = vsel %vm877_vm2, %v4478_v16, %v820_v52 }
 0x1cf   : > { %v1606_v32 = vadd.f32 %v1605_v19, %v1493_v60  ;;  %1429 = vmatmul.f32.gmra.mxu2 %v965_v15  ;;  %2138 = vmatmul.msk.f32.gmra.mxu0 %vm877_vm2, %v3393_v53  ;;  %v1278_v45 = vpop.f32.mrf.mxu1  ;;  %v1163_v15 = vadd.f32 %v3675_v44, %v3818_v7 }
 0x1d0   : > { %1542 = vmatmul.f32.gmra.mxu3 %v3551_v36  ;;  %v4476_v36 = vld [vmem:[#allocation48_spill] sm:$0xff] }
 0x1d1   : > { %v1689_v1 = vmax.f32 %v1606_v32, 0.0  ;;  %v1276_v32 = vadd.f32 %v1275_v29, %v1163_v15  ;;  %v4483_v29 = vld [vmem:[#allocation51_spill] sm:$0xff]  ;;  %v1169_v15 = vadd.f32 %v3675_v44, %v3874_v22 }
 0x1d2   : > { %v1382_v51 = vpop.f32.mrf.mxu2 }
 0x1d3   : > { %v1383_v30 = vadd.f32 %v1382_v51, %v1270_v34  ;;  %v1495_v48 = vpop.f32.mrf.mxu3  ;;  %2154 = vmatmul.msk.f32.gmra.mxu1 %vm877_vm2, %v1689_v1  ;;  %v822_v1 = vpop.permute.xlu0 %821 }
 0x1d4   : > { %v1608_v25 = vpop.f32.mrf.mxu0 }
 0x1d5   : > { %v1496_v24 = vadd.f32 %v1495_v48, %v1383_v30 }
 0x1d7   : > { %v1609_v53 = vadd.f32 %v1608_v25, %v1496_v24  ;;  %1432 = vmatmul.f32.gmra.mxu2 %v966_v10  ;;  %2139 = vmatmul.msk.f32.gmra.mxu0 %vm877_vm2, %v4476_v36  ;;  %v4481_v25 = vld [vmem:[#allocation29_spill] sm:$0xff]  ;;  %v1281_v24 = vpop.f32.mrf.mxu1  ;;  %v4482_v36 = vld [vmem:[#allocation47_spill] sm:$0xff] }
 0x1d8   : > { %1545 = vmatmul.f32.gmra.mxu3 %v4477_v47  ;;  %v968_v10 = vsel %vm877_vm2, %v4481_v25, %v822_v1  ;;  %v1279_v47 = vadd.f32 %v1278_v45, %v1166_v27 }
 0x1d9   : > { %v1690_v46 = vmax.f32 %v1609_v53, 0.0 }
 0x1da   : > { %v1385_v2 = vpop.f32.mrf.mxu2 }
 0x1db   : > { %v1386_v12 = vadd.f32 %v1385_v2, %v1273_v56  ;;  %v1498_v63 = vpop.f32.mrf.mxu3  ;;  %2155 = vmatmul.msk.f32.gmra.mxu1 %vm877_vm2, %v1690_v46  ;;  %v824_v46 = vpop.permute.xlu1 %823 }
 0x1dc   : > { %v1611_v11 = vpop.f32.mrf.mxu0  ;;  %v2388_v27 = vpop.permute.xlu0 %2387 }
 0x1dd   : > { %v1499_v19 = vadd.f32 %v1498_v63, %v1386_v12 }
 0x1df   : > { %v1612_v60 = vadd.f32 %v1611_v11, %v1499_v19  ;;  %1435 = vmatmul.f32.gmra.mxu2 %v967_v26  ;;  %2140 = vmatmul.msk.f32.gmra.mxu0 %vm877_vm2, %v4479_v35  ;;  %v4484_v11 = vld [vmem:[#allocation27_spill] sm:$0xff]  ;;  %v2383_v19 = vpop.permute.xlu2 %2382  ;;  %v1284_v45 = vpop.f32.mrf.mxu1 }
 0x1e0   : > { %1548 = vmatmul.f32.gmra.mxu3 %v4480_v17  ;;  %v969_v26 = vsel %vm877_vm2, %v4484_v11, %v824_v46  ;;  %v4485_v35 = vld [vmem:[#allocation35_spill] sm:$0xff]  ;;  %v2384_v17 = vunpack.i.l.bf16 %v2383_v19  ;;  %v2385_v1 = vunpack.i.h.bf16 %v2383_v19  ;;  %v1175_v19 = vadd.f32 %v3675_v44, %v3906_v31 }
 0x1e1   : > { %v1691_v34 = vmax.f32 %v1612_v60, 0.0 }
 0x1e2   : > { %v1388_v4 = vpop.f32.mrf.mxu2 }
 0x1e3   : > { %v1389_v51 = vadd.f32 %v1388_v4, %v1276_v32  ;;  %v1501_v30 = vpop.f32.mrf.mxu3  ;;  %2156 = vmatmul.msk.f32.gmra.mxu1 %vm877_vm2, %v1691_v34  ;;  %v1282_v32 = vadd.f32 %v1281_v24, %v1169_v15 }
 0x1e4   : > { %v1614_v48 = vpop.f32.mrf.mxu0 }
 0x1e5   : > { %v1502_v7 = vadd.f32 %v1501_v30, %v1389_v51 }
 0x1e7   : > { %v1615_v53 = vadd.f32 %v1614_v48, %v1502_v7  ;;  %1438 = vmatmul.f32.gmra.mxu2 %v968_v10  ;;  %2141 = vmatmul.msk.f32.gmra.mxu0 %vm877_vm2, %v4482_v36  ;;  %v4486_v10 = vld [vmem:[#allocation33_spill] sm:$0xff]  ;;  %v2389_v36 = vunpack.i.l.bf16 %v2388_v27  ;;  %v1287_v46 = vpop.f32.mrf.mxu1 }
 0x1e8   : > { %1551 = vmatmul.f32.gmra.mxu3 %v4483_v29  ;;  %v970_v22 = vsel %vm877_vm2, %v4486_v10, %v2384_v17 }
 0x1e9   : > { %v1692_v56 = vmax.f32 %v1615_v53, 0.0  ;;  %v1172_v53 = vadd.f32 %v3675_v44, %v3895_v18 }
 0x1ea   : > { %v1391_v52 = vpop.f32.mrf.mxu2 }
 0x1eb   : > { %v1392_v2 = vadd.f32 %v1391_v52, %v1279_v47  ;;  %v1504_v12 = vpop.f32.mrf.mxu3  ;;  %2157 = vmatmul.msk.f32.gmra.mxu1 %vm877_vm2, %v1692_v56  ;;  %v1285_v29 = vadd.f32 %v1284_v45, %v1172_v53  ;;  %v2390_v56 = vunpack.i.h.bf16 %v2388_v27  ;;  %v1288_v45 = vadd.f32 %v1287_v46, %v1175_v19 }
 0x1ec   : > { %v1617_v63 = vpop.f32.mrf.mxu0  ;;  %v573_v27 = vrot.slane %v3852_v54, 2 }
 0x1ed   : > { %v1505_v50 = vadd.f32 %v1504_v12, %v1392_v2 }
 0x1ef   : > { %v1618_v60 = vadd.f32 %v1617_v63, %v1505_v50  ;;  %1441 = vmatmul.f32.gmra.mxu2 %v969_v26  ;;  %2142 = vmatmul.msk.f32.gmra.mxu0 %vm877_vm2, %v3614_v43  ;;  %v974_v43 = vsel %vm877_vm2, %v3857_v20, %v2385_v1  ;;  %v4487_v63 = vld [vmem:[#allocation31_spill] sm:$0xff]  ;;  %v975_v50 = vsel %vm877_vm2, %v3814_v61, %v2390_v56  ;;  %v1290_v61 = vpop.f32.mrf.mxu1 }
 0x1f0   : > { %1554 = vmatmul.f32.gmra.mxu3 %v4485_v35  ;;  %v971_v18 = vsel %vm877_vm2, %v4487_v63, %v2389_v36 }
 0x1f1   : > { %v1693_v34 = vmax.f32 %v1618_v60, 0.0 }
 0x1f2   : > { %v1394_v4 = vpop.f32.mrf.mxu2 }
 0x1f3   : > { %v1395_v51 = vadd.f32 %v1394_v4, %v1282_v32  ;;  %v1507_v30 = vpop.f32.mrf.mxu3  ;;  %2158 = vmatmul.msk.f32.gmra.mxu1 %vm877_vm2, %v1693_v34 }
 0x1f4   : > { %v1620_v48 = vpop.f32.mrf.mxu0 }
 0x1f5   : > { %v1508_v7 = vadd.f32 %v1507_v30, %v1395_v51 }
 0x1f7   : > { %v1621_v24 = vadd.f32 %v1620_v48, %v1508_v7  ;;  %1444 = vmatmul.f32.gmra.mxu2 %v970_v22  ;;  %2143 = vmatmul.msk.f32.gmra.mxu0 %vm877_vm2, %v3639_v58  ;;  %v2393_v58 = vpop.permute.xlu1 %2392  ;;  %v1178_v48 = vadd.f32 %v3675_v44, %v3917_v33 }
 0x1f8   : > { %1557 = vmatmul.f32.gmra.mxu3 %v974_v43  ;;  %v2394_v60 = vunpack.i.l.bf16 %v2393_v58  ;;  %v2395_v17 = vunpack.i.h.bf16 %v2393_v58  ;;  %v572_v43 = vrot.slane %v3849_v55, 2 }
 0x1f9   : > { %v1694_v47 = vmax.f32 %v1621_v24, 0.0  ;;  %v1291_v53 = vadd.f32 %v1290_v61, %v1178_v48  ;;  %v4489_v48 = vld [vmem:[#allocation36_spill] sm:$0xff] }
 0x1fa   : > { %v1397_v52 = vpop.f32.mrf.mxu2  ;;  %v972_v31 = vsel %vm877_vm2, %v3888_v14, %v2394_v60  ;;  %v976_v30 = vsel %vm877_vm2, %v3849_v55, %v2395_v17 }
 0x1fb   : > { %v1398_v2 = vadd.f32 %v1397_v52, %v1285_v29  ;;  %v1510_v12 = vpop.f32.mrf.mxu3  ;;  %2159 = vmatmul.msk.f32.gmra.mxu1 %vm877_vm2, %v1694_v47 }
 0x1fc   : > { %v1623_v20 = vpop.f32.mrf.mxu0 }
 0x1fd   : > { %v1511_v26 = vadd.f32 %v1510_v12, %v1398_v2  ;;  %v1293_v2 = vpop.f32.mrf.mxu1  ;;  %v1181_v12 = vadd.f32 %v3675_v44, %v3940_v62 }
 0x1ff   : > { %v1624_v15 = vadd.f32 %v1623_v20, %v1511_v26  ;;  %1447 = vmatmul.f32.gmra.mxu2 %v971_v18  ;;  %2144 = vmatmul.msk.f32.gmra.mxu0 %vm877_vm2, %v3867_v5  ;;  %v2398_v5 = vpop.permute.xlu2 %2397  ;;  %v575_v18 = vrot.slane %v3922_v9, 2  ;;  %v1294_v26 = vadd.f32 %v1293_v2, %v1181_v12 }
 0x200   : > { %1560 = vmatmul.f32.gmra.mxu3 %v975_v50  ;;  %v2399_v7 = vunpack.i.l.bf16 %v2398_v5  ;;  %v2400_v36 = vunpack.i.h.bf16 %v2398_v5 }
 0x201   : > { %v1695_v35 = vmax.f32 %v1624_v15, 0.0  ;;  %v576_v60 = vsel %vm406_vm1, %v573_v27, %v575_v18 }
 0x202   : > { %v1400_v32 = vpop.f32.mrf.mxu2  ;;  %v973_v46 = vsel %vm877_vm2, %v3835_v23, %v2399_v7  ;;  %v977_v55 = vsel %vm877_vm2, %v3852_v54, %v2400_v36 }
 0x203   : > { %v1401_v34 = vadd.f32 %v1400_v32, %v1288_v45  ;;  %v1513_v1 = vpop.f32.mrf.mxu3  ;;  %2160 = vmatmul.msk.f32.gmra.mxu1 %vm877_vm2, %v1695_v35 }
 0x204   : > { %v1626_v4 = vpop.f32.mrf.mxu0 }
 0x205   : > { %v1514_v51 = vadd.f32 %v1513_v1, %v1401_v34  ;;  %v4085_v1 = vld [vmem:[%s4289_s4] ss:$0 sm:$0xff] }
 0x207   : > { %v1627_v22 = vadd.f32 %v1626_v4, %v1514_v51  ;;  %1450 = vmatmul.f32.gmra.mxu2 %v972_v31  ;;  %2145 = vmatmul.msk.f32.gmra.mxu0 %vm877_vm2, %v3933_v41  ;;  %v574_v41 = vsel %vm406_vm1, %v572_v43, %v573_v27 }
 0x208   : > { %1563 = vmatmul.f32.gmra.mxu3 %v976_v30 }
 0x209   : > { %v1696_v24 = vmax.f32 %v1627_v22, 0.0 }
 0x20a   : > { %v1403_v29 = vpop.f32.mrf.mxu2 }
 0x20b   : > { %v1404_v47 = vadd.f32 %v1403_v29, %v1291_v53  ;;  %v1516_v56 = vpop.f32.mrf.mxu3  ;;  %2161 = vmatmul.msk.f32.gmra.mxu1 %vm877_vm2, %v1696_v24 }
 0x20c   : > { %v1629_v33 = vpop.f32.mrf.mxu0 }
 0x20d   : > { %v1517_v52 = vadd.f32 %v1516_v56, %v1404_v47 }
 0x20f   : > { %v1630_v20 = vadd.f32 %v1629_v33, %v1517_v52  ;;  %1453 = vmatmul.f32.gmra.mxu2 %v973_v46  ;;  %2146 = vmatmul.msk.f32.gmra.mxu0 %vm877_vm2, %v574_v41  ;;  %v4490_v33 = vld [vmem:[#allocation12_spill] sm:$0xff] }
 0x210   : > { %1566 = vmatmul.f32.gmra.mxu3 %v977_v55 }
 0x211   : > { %v1697_v50 = vmax.f32 %v1630_v20, 0.0 }
 0x212   : > { %v1406_v58 = vpop.f32.mrf.mxu2 }
 0x213   : > { %v1407_v19 = vadd.f32 %v1406_v58, %v1294_v26  ;;  %v1519_v15 = vpop.f32.mrf.mxu3  ;;  %2162 = vmatmul.msk.f32.gmra.mxu1 %vm877_vm2, %v1697_v50 }
 0x214   : > { %v1632_v54 = vpop.f32.mrf.mxu0 }
 0x215   : > { %v1520_v44 = vadd.f32 %v1519_v15, %v1407_v19  ;;  %v4491_v19 = vld [vmem:[#allocation10_spill] sm:$0xff] }
 0x217   : > { %v1633_v62 = vadd.f32 %v1632_v54, %v1520_v44  ;;  %2147 = vmatmul.msk.f32.gmra.mxu0 %vm877_vm2, %v576_v60  ;;  %v4492_v54 = vld [vmem:[#allocation39_spill] sm:$0xff] }
 0x219   : > { %v1698_v45 = vmax.f32 %v1633_v62, 0.0 }
 0x21a   : > { %v1409_v35 = vpop.f32.mrf.mxu2 }
 0x21b   : > { %v1410_v9 = vadd.f32 %v1409_v35, %v3686_v8  ;;  %v1522_v17 = vpop.f32.mrf.mxu3  ;;  %2163 = vmatmul.msk.f32.gmra.mxu1 %vm877_vm2, %v1698_v45  ;;  %v4488_v8 = vld [vmem:[#allocation8_spill] sm:$0xff] }
 0x21c   : > { %v1635_v32 = vpop.f32.mrf.mxu0 }
 0x21d   : > { %v1523_v34 = vadd.f32 %v1522_v17, %v1410_v9 }
 0x21f   : > { %v1636_v61 = vadd.f32 %v1635_v32, %v1523_v34 }
 0x220   : > { %v1840_v4 = vpop.f32.mrf.mxu1 }
 0x221   : > { %v1699_v31 = vmax.f32 %v1636_v61, 0.0  ;;  %v1841_v51 = vadd.f32 %v4085_v1, %v1840_v4  ;;  %v4493_v61 = vld [vmem:[#allocation16_spill] sm:$0xff] }
 0x222   : > { %v1412_v30 = vpop.f32.mrf.mxu2 }
 0x223   : > { %v1936_v5 = vadd.f32 %v1841_v51, %v4488_v8  ;;  %v1413_v22 = vadd.f32 %v1412_v30, %v4489_v48  ;;  %v1525_v7 = vpop.f32.mrf.mxu3  ;;  %2164 = vmatmul.msk.f32.gmra.mxu1 %vm877_vm2, %v1699_v31 }
 0x224   : > { %v1638_v43 = vpop.f32.mrf.mxu0 }
 0x225   : > { %v1968_v27 = vmax.f32 %v1936_v5, 0.0  ;;  %v1526_v53 = vadd.f32 %v1525_v7, %v1413_v22 }
 0x227   : > { %2000 = vst.msk [vmem:[%s4094_s30] sm:$0xff] %vm877_vm2, %v1968_v27  ;;  %v1639_v24 = vadd.f32 %v1638_v43, %v1526_v53  ;;  %v4494_v53 = vld [vmem:[#allocation14_spill] sm:$0xff] }
 0x228   : > { %v1843_v36 = vpop.f32.mrf.mxu1 }
 0x229   : > { %v1700_v29 = vmax.f32 %v1639_v24, 0.0  ;;  %v1844_v47 = vadd.f32 %v4085_v1, %v1843_v36 }
 0x22a   : > { %v1415_v56 = vpop.f32.mrf.mxu2 }
 0x22b   : > { %v1937_v46 = vadd.f32 %v1844_v47, %v4490_v33  ;;  %v1416_v41 = vadd.f32 %v1415_v56, %v3719_v59  ;;  %v1528_v52 = vpop.f32.mrf.mxu3  ;;  %2165 = vmatmul.msk.f32.gmra.mxu1 %vm877_vm2, %v1700_v29 }
 0x22c   : > { %v1641_v55 = vpop.f32.mrf.mxu0 }
 0x22d   : > { %v1969_v2 = vmax.f32 %v1937_v46, 0.0  ;;  %v1529_v12 = vadd.f32 %v1528_v52, %v1416_v41 }
 0x22f   : > { %2001 = vst.msk [vmem:[%s4094_s30 + $0x8] sm:$0xff] %vm877_vm2, %v1969_v2  ;;  %v1642_v20 = vadd.f32 %v1641_v55, %v1529_v12  ;;  %v4495_v12 = vld [vmem:[#allocation37_spill] sm:$0xff] }
 0x230   : > { %v1846_v18 = vpop.f32.mrf.mxu1 }
 0x231   : > { %v1701_v26 = vmax.f32 %v1642_v20, 0.0  ;;  %v1847_v50 = vadd.f32 %v4085_v1, %v1846_v18 }
 0x232   : > { %v1418_v58 = vpop.f32.mrf.mxu2 }
 0x233   : > { %v1938_v15 = vadd.f32 %v1847_v50, %v4491_v19  ;;  %v1419_v60 = vadd.f32 %v1418_v58, %v4492_v54  ;;  %v1531_v59 = vpop.f32.mrf.mxu3  ;;  %2166 = vmatmul.msk.f32.gmra.mxu1 %vm877_vm2, %v1701_v26 }
 0x234   : > { %v1644_v44 = vpop.f32.mrf.mxu0 }
 0x235   : > { %v1970_v62 = vmax.f32 %v1938_v15, 0.0  ;;  %v1532_v45 = vadd.f32 %v1531_v59, %v1419_v60  ;;  %v4496_v59 = vld [vmem:[#allocation18_spill] sm:$0xff] }
 0x237   : > { %2002 = vst.msk [vmem:[%s4094_s30 + $0x10] sm:$0xff] %vm877_vm2, %v1970_v62  ;;  %v1645_v35 = vadd.f32 %v1644_v44, %v1532_v45 }
 0x238   : > { %v1849_v9 = vpop.f32.mrf.mxu1 }
 0x239   : > { %v1702_v17 = vmax.f32 %v1645_v35, 0.0  ;;  %v1850_v32 = vadd.f32 %v4085_v1, %v1849_v9 }
 0x23a   : > { %v1421_v34 = vpop.f32.mrf.mxu2 }
 0x23b   : > { %v1939_v4 = vadd.f32 %v1850_v32, %v4493_v61  ;;  %v1422_v31 = vadd.f32 %v1421_v34, %v3752_v49  ;;  %v1534_v51 = vpop.f32.mrf.mxu3  ;;  %2167 = vmatmul.msk.f32.gmra.mxu1 %vm877_vm2, %v1702_v17 }
 0x23c   : > { %v1647_v30 = vpop.f32.mrf.mxu0 }
 0x23d   : > { %v1971_v8 = vmax.f32 %v1939_v4, 0.0  ;;  %v1535_v5 = vadd.f32 %v1534_v51, %v1422_v31  ;;  %v4498_v51 = vld [vmem:[#allocation24_spill] sm:$0xff] }
 0x23f   : > { %2003 = vst.msk [vmem:[%s4094_s30 + $0x18] sm:$0xff] %vm877_vm2, %v1971_v8  ;;  %v1648_v48 = vadd.f32 %v1647_v30, %v1535_v5  ;;  %v4499_v8 = vld [vmem:[#allocation41_spill] sm:$0xff] }
 0x240   : > { %v1852_v22 = vpop.f32.mrf.mxu1 }
 0x241   : > { %v1703_v7 = vmax.f32 %v1648_v48, 0.0  ;;  %v1853_v43 = vadd.f32 %v4085_v1, %v1852_v22 }
 0x242   : > { %v1424_v27 = vpop.f32.mrf.mxu2 }
 0x243   : > { %v1940_v24 = vadd.f32 %v1853_v43, %v4494_v53  ;;  %v1425_v36 = vadd.f32 %v1424_v27, %v3767_v39  ;;  %v1537_v49 = vpop.f32.mrf.mxu3  ;;  %2168 = vmatmul.msk.f32.gmra.mxu1 %vm877_vm2, %v1703_v7 }
 0x244   : > { %v1650_v29 = vpop.f32.mrf.mxu0 }
 0x245   : > { %v1972_v47 = vmax.f32 %v1940_v24, 0.0  ;;  %v1538_v56 = vadd.f32 %v1537_v49, %v1425_v36 }
 0x247   : > { %2004 = vst.msk [vmem:[%s4094_s30 + $0x20] sm:$0xff] %vm877_vm2, %v1972_v47  ;;  %v1651_v33 = vadd.f32 %v1650_v29, %v1538_v56  ;;  %v4500_v29 = vld [vmem:[#allocation22_spill] sm:$0xff]  ;;  %v4501_v56 = vld [vmem:[#allocation20_spill] sm:$0xff] }
 0x248   : > { %v1855_v46 = vpop.f32.mrf.mxu1 }
 0x249   : > { %v1704_v41 = vmax.f32 %v1651_v33, 0.0  ;;  %v1856_v52 = vadd.f32 %v4085_v1, %v1855_v46 }
 0x24a   : > { %v1427_v55 = vpop.f32.mrf.mxu2 }
 0x24b   : > { %v1941_v2 = vadd.f32 %v1856_v52, %v4440_v37  ;;  %v1428_v20 = vadd.f32 %v1427_v55, %v4495_v12  ;;  %v1540_v39 = vpop.f32.mrf.mxu3  ;;  %2169 = vmatmul.msk.f32.gmra.mxu1 %vm877_vm2, %v1704_v41  ;;  %v4497_v37 = vld [vmem:[#allocation38_spill] sm:$0xff] }
 0x24c   : > { %v1653_v18 = vpop.f32.mrf.mxu0 }
 0x24d   : > { %v1973_v26 = vmax.f32 %v1941_v2, 0.0  ;;  %v1541_v50 = vadd.f32 %v1540_v39, %v1428_v20 }
 0x24f   : > { %2005 = vst.msk [vmem:[%s4094_s30 + $0x28] sm:$0xff] %vm877_vm2, %v1973_v26  ;;  %v1654_v58 = vadd.f32 %v1653_v18, %v1541_v50  ;;  %v4502_v26 = vld [vmem:[#allocation28_spill] sm:$0xff] }
 0x250   : > { %v1858_v19 = vpop.f32.mrf.mxu1 }
 0x251   : > { %v1705_v15 = vmax.f32 %v1654_v58, 0.0  ;;  %v1859_v54 = vadd.f32 %v4085_v1, %v1858_v19  ;;  %v4503_v58 = vld [vmem:[#allocation52_spill] sm:$0xff] }
 0x252   : > { %v1430_v60 = vpop.f32.mrf.mxu2 }
 0x253   : > { %v1942_v44 = vadd.f32 %v1859_v54, %v4496_v59  ;;  %v1431_v62 = vadd.f32 %v1430_v60, %v4497_v37  ;;  %v1543_v45 = vpop.f32.mrf.mxu3  ;;  %2170 = vmatmul.msk.f32.gmra.mxu1 %vm877_vm2, %v1705_v15 }
 0x254   : > { %v1656_v35 = vpop.f32.mrf.mxu0 }
 0x255   : > { %v1974_v9 = vmax.f32 %v1942_v44, 0.0  ;;  %v1544_v17 = vadd.f32 %v1543_v45, %v1431_v62 }
 0x257   : > { %2006 = vst.msk [vmem:[%s4094_s30 + $0x30] sm:$0xff] %vm877_vm2, %v1974_v9  ;;  %v1657_v32 = vadd.f32 %v1656_v35, %v1544_v17  ;;  %v4504_v9 = vld [vmem:[#allocation26_spill] sm:$0xff] }
 0x258   : > { %v1861_v34 = vpop.f32.mrf.mxu1 }
 0x259   : > { %v1706_v61 = vmax.f32 %v1657_v32, 0.0  ;;  %v1862_v4 = vadd.f32 %v4085_v1, %v1861_v34  ;;  %v4505_v32 = vld [vmem:[#allocation53_spill] sm:$0xff] }
 0x25a   : > { %v1433_v31 = vpop.f32.mrf.mxu2 }
 0x25b   : > { %v1943_v30 = vadd.f32 %v1862_v4, %v4498_v51  ;;  %v1434_v5 = vadd.f32 %v1433_v31, %v4499_v8  ;;  %v1546_v48 = vpop.f32.mrf.mxu3  ;;  %2171 = vmatmul.msk.f32.gmra.mxu1 %vm877_vm2, %v1706_v61 }
 0x25c   : > { %v1659_v22 = vpop.f32.mrf.mxu0 }
 0x25d   : > { %v1975_v7 = vmax.f32 %v1943_v30, 0.0  ;;  %v1547_v43 = vadd.f32 %v1546_v48, %v1434_v5 }
 0x25f   : > { %2007 = vst.msk [vmem:[%s4094_s30 + $0x38] sm:$0xff] %vm877_vm2, %v1975_v7  ;;  %v1660_v27 = vadd.f32 %v1659_v22, %v1547_v43  ;;  %v4506_v7 = vld [vmem:[#allocation32_spill] sm:$0xff] }
 0x260   : > { %v1864_v53 = vpop.f32.mrf.mxu1 }
 0x261   : > { %v1707_v24 = vmax.f32 %v1660_v27, 0.0  ;;  %v1865_v36 = vadd.f32 %v4085_v1, %v1864_v53  ;;  %v4507_v27 = vld [vmem:[#allocation40_spill] sm:$0xff] }
 0x262   : > { %v1436_v49 = vpop.f32.mrf.mxu2 }
 0x263   : > { %v1944_v47 = vadd.f32 %v1865_v36, %v4500_v29  ;;  %v1437_v33 = vadd.f32 %v1436_v49, %v4501_v56  ;;  %v1549_v46 = vpop.f32.mrf.mxu3  ;;  %2172 = vmatmul.msk.f32.gmra.mxu1 %vm877_vm2, %v1707_v24 }
 0x264   : > { %v1662_v41 = vpop.f32.mrf.mxu0 }
 0x265   : > { %v1976_v52 = vmax.f32 %v1944_v47, 0.0  ;;  %v1550_v55 = vadd.f32 %v1549_v46, %v1437_v33 }
 0x267   : > { %2008 = vst.msk [vmem:[%s4094_s30 + $0x40] sm:$0xff] %vm877_vm2, %v1976_v52  ;;  %v1663_v2 = vadd.f32 %v1662_v41, %v1550_v55  ;;  %v4508_v52 = vld [vmem:[#allocation30_spill] sm:$0xff] }
 0x268   : > { %v1867_v12 = vpop.f32.mrf.mxu1 }
 0x269   : > { %v1708_v20 = vmax.f32 %v1663_v2, 0.0  ;;  %v1868_v39 = vadd.f32 %v4085_v1, %v1867_v12  ;;  %v4509_v2 = vld [vmem:[#allocation42_spill] sm:$0xff] }
 0x26a   : > { %v1439_v18 = vpop.f32.mrf.mxu2 }
 0x26b   : > { %v1945_v50 = vadd.f32 %v1868_v39, %v4502_v26  ;;  %v1440_v19 = vadd.f32 %v1439_v18, %v4503_v58  ;;  %v1552_v15 = vpop.f32.mrf.mxu3  ;;  %2173 = vmatmul.msk.f32.gmra.mxu1 %vm877_vm2, %v1708_v20 }
 0x26c   : > { %v1665_v54 = vpop.f32.mrf.mxu0 }
 0x26d   : > { %v1977_v60 = vmax.f32 %v1945_v50, 0.0  ;;  %v1553_v59 = vadd.f32 %v1552_v15, %v1440_v19 }
 0x26f   : > { %2009 = vst.msk [vmem:[%s4094_s30 + $0x48] sm:$0xff] %vm877_vm2, %v1977_v60  ;;  %v1666_v44 = vadd.f32 %v1665_v54, %v1553_v59  ;;  %v4510_v60 = vld [vmem:[#allocation34_spill] sm:$0xff] }
 0x270   : > { %v1870_v37 = vpop.f32.mrf.mxu1 }
 0x271   : > { %v1709_v62 = vmax.f32 %v1666_v44, 0.0  ;;  %v1871_v45 = vadd.f32 %v4085_v1, %v1870_v37  ;;  %v4511_v44 = vld [vmem:[#allocation54_spill] sm:$0xff] }
 0x272   : > { %v1442_v35 = vpop.f32.mrf.mxu2 }
 0x273   : > { %v1946_v17 = vadd.f32 %v1871_v45, %v4504_v9  ;;  %v1443_v34 = vadd.f32 %v1442_v35, %v4505_v32  ;;  %v1555_v61 = vpop.f32.mrf.mxu3  ;;  %2174 = vmatmul.msk.f32.gmra.mxu1 %vm877_vm2, %v1709_v62 }
 0x274   : > { %v1668_v4 = vpop.f32.mrf.mxu0 }
 0x275   : > { %v1978_v31 = vmax.f32 %v1946_v17, 0.0  ;;  %v1556_v51 = vadd.f32 %v1555_v61, %v1443_v34 }
 0x277   : > { %2010 = vst.msk [vmem:[%s4094_s30 + $0x50] sm:$0xff] %vm877_vm2, %v1978_v31  ;;  %v1669_v30 = vadd.f32 %v1668_v4, %v1556_v51  ;;  %v4512_v31 = vld [vmem:[#allocation6_spill] sm:$0xff] }
 0x278   : > { %v1873_v8 = vpop.f32.mrf.mxu1 }
 0x279   : > { %v1710_v5 = vmax.f32 %v1669_v30, 0.0  ;;  %v1874_v48 = vadd.f32 %v4085_v1, %v1873_v8 }
 0x27a   : > { %v1445_v22 = vpop.f32.mrf.mxu2 }
 0x27b   : > { %v1947_v43 = vadd.f32 %v1874_v48, %v4506_v7  ;;  %v1446_v53 = vadd.f32 %v1445_v22, %v4507_v27  ;;  %v1558_v24 = vpop.f32.mrf.mxu3  ;;  %2175 = vmatmul.msk.f32.gmra.mxu1 %vm877_vm2, %v1710_v5 }
 0x27c   : > { %v1671_v36 = vpop.f32.mrf.mxu0 }
 0x27d   : > { %v1979_v49 = vmax.f32 %v1947_v43, 0.0  ;;  %v1559_v29 = vadd.f32 %v1558_v24, %v1446_v53  ;;  %v4513_v24 = vld [vmem:[#allocation7_spill] sm:$0xff] }
 0x27f   : > { %2011 = vst.msk [vmem:[%s4094_s30 + $0x58] sm:$0xff] %vm877_vm2, %v1979_v49  ;;  %v1672_v47 = vadd.f32 %v1671_v36, %v1559_v29 }
 0x280   : > { %v1876_v56 = vpop.f32.mrf.mxu1 }
 0x281   : > { %v1711_v33 = vmax.f32 %v1672_v47, 0.0  ;;  %v1877_v46 = vadd.f32 %v4085_v1, %v1876_v56 }
 0x282   : > { %v1448_v41 = vpop.f32.mrf.mxu2 }
 0x283   : > { %v1948_v55 = vadd.f32 %v1877_v46, %v4508_v52  ;;  %v1449_v12 = vadd.f32 %v1448_v41, %v4509_v2  ;;  %v1561_v20 = vpop.f32.mrf.mxu3  ;;  %2176 = vmatmul.msk.f32.gmra.mxu1 %vm877_vm2, %v1711_v33 }
 0x284   : > { %v1674_v39 = vpop.f32.mrf.mxu0 }
 0x285   : > { %v1980_v18 = vmax.f32 %v1948_v55, 0.0  ;;  %v1562_v26 = vadd.f32 %v1561_v20, %v1449_v12 }
 0x287   : > { %2012 = vst.msk [vmem:[%s4094_s30 + $0x60] sm:$0xff] %vm877_vm2, %v1980_v18  ;;  %v1675_v50 = vadd.f32 %v1674_v39, %v1562_v26 }
 0x288   : > { %v1879_v58 = vpop.f32.mrf.mxu1 }
 0x289   : > { %v1712_v19 = vmax.f32 %v1675_v50, 0.0  ;;  %v1880_v15 = vadd.f32 %v4085_v1, %v1879_v58 }
 0x28a   : > { %v1451_v54 = vpop.f32.mrf.mxu2 }
 0x28b   : > { %v1949_v59 = vadd.f32 %v1880_v15, %v4510_v60  ;;  %v1452_v37 = vadd.f32 %v1451_v54, %v4511_v44  ;;  %v1564_v62 = vpop.f32.mrf.mxu3  ;;  %2177 = vmatmul.msk.f32.gmra.mxu1 %vm877_vm2, %v1712_v19 }
 0x28c   : > { %v1677_v45 = vpop.f32.mrf.mxu0 }
 0x28d   : > { %v1981_v35 = vmax.f32 %v1949_v59, 0.0  ;;  %v1565_v9 = vadd.f32 %v1564_v62, %v1452_v37 }
 0x28f   : > { %2013 = vst.msk [vmem:[%s4094_s30 + $0x68] sm:$0xff] %vm877_vm2, %v1981_v35  ;;  %v1678_v17 = vadd.f32 %v1677_v45, %v1565_v9 }
 0x290   : > { %v1882_v32 = vpop.f32.mrf.mxu1 }
 0x291   : > { %v1713_v34 = vmax.f32 %v1678_v17, 0.0  ;;  %v1883_v61 = vadd.f32 %v4085_v1, %v1882_v32 }
 0x292   : > { %v1454_v4 = vpop.f32.mrf.mxu2 }
 0x293   : > { %v1950_v51 = vadd.f32 %v1883_v61, %v4512_v31  ;;  %v1455_v30 = vadd.f32 %v1454_v4, %v3944_v6  ;;  %2178 = vmatmul.msk.f32.gmra.mxu1 %vm877_vm2, %v1713_v34  ;;  %v1567_v8 = vpop.f32.mrf.mxu3 }
 0x294   : > { %v1680_v5 = vpop.f32.mrf.mxu0 }
 0x295   : > { %v1982_v48 = vmax.f32 %v1950_v51, 0.0  ;;  %v1568_v22 = vadd.f32 %v1567_v8, %v1455_v30 }
 0x297   : > { %2014 = vst.msk [vmem:[%s4094_s30 + $0x70] sm:$0xff] %vm877_vm2, %v1982_v48  ;;  %v1681_v7 = vadd.f32 %v1680_v5, %v1568_v22 }
 0x298   : > { %v1885_v43 = vpop.f32.mrf.mxu1 }
 0x299   : > { %v1714_v27 = vmax.f32 %v1681_v7, 0.0  ;;  %v1886_v53 = vadd.f32 %v4085_v1, %v1885_v43 }
 0x29b   : > { %v1951_v36 = vadd.f32 %v1886_v53, %v4513_v24  ;;  %2179 = vmatmul.msk.f32.gmra.mxu1 %vm877_vm2, %v1714_v27 }
 0x29d   : > { %v1983_v6 = vmax.f32 %v1951_v36, 0.0 }
 0x29f   : > { %2015 = vst.msk [vmem:[%s4094_s30 + $0x78] sm:$0xff] %vm877_vm2, %v1983_v6 }
 0x2a0   : > { %v1888_v49 = vpop.f32.mrf.mxu1 }
 0x2a1   : > { %v1889_v29 = vadd.f32 %v4085_v1, %v1888_v49 }
 0x2a3   : > { %v1952_v47 = vadd.f32 %v1889_v29, %v4464_v42 }
 0x2a5   : > { %v1984_v56 = vmax.f32 %v1952_v47, 0.0 }
 0x2a7   : > { %2016 = vst.msk [vmem:[%s4094_s30 + $0x80] sm:$0xff] %vm877_vm2, %v1984_v56 }
 0x2a8   : > { %v1891_v33 = vpop.f32.mrf.mxu1 }
 0x2a9   : > { %v1892_v46 = vadd.f32 %v4085_v1, %v1891_v33 }
 0x2ab   : > { %v1953_v41 = vadd.f32 %v1892_v46, %v4465_v21 }
 0x2ad   : > { %v1985_v52 = vmax.f32 %v1953_v41, 0.0 }
 0x2af   : > { %2017 = vst.msk [vmem:[%s4094_s30 + $0x88] sm:$0xff] %vm877_vm2, %v1985_v52 }
 0x2b0   : > { %v1894_v55 = vpop.f32.mrf.mxu1 }
 0x2b1   : > { %v1895_v2 = vadd.f32 %v4085_v1, %v1894_v55 }
 0x2b3   : > { %v1954_v12 = vadd.f32 %v1895_v2, %v4466_v57 }
 0x2b5   : > { %v1986_v20 = vmax.f32 %v1954_v12, 0.0 }
 0x2b7   : > { %2018 = vst.msk [vmem:[%s4094_s30 + $0x90] sm:$0xff] %vm877_vm2, %v1986_v20 }
 0x2b8   : > { %v1897_v42 = vpop.f32.mrf.mxu1 }
 0x2b9   : > { %v1898_v39 = vadd.f32 %v4085_v1, %v1897_v42 }
 0x2bb   : > { %v1955_v18 = vadd.f32 %v1898_v39, %v4467_v40 }
 0x2bd   : > { %v1987_v26 = vmax.f32 %v1955_v18, 0.0 }
 0x2bf   : > { %2019 = vst.msk [vmem:[%s4094_s30 + $0x98] sm:$0xff] %vm877_vm2, %v1987_v26 }
 0x2c0   : > { %v1900_v21 = vpop.f32.mrf.mxu1 }
 0x2c1   : > { %v1901_v50 = vadd.f32 %v4085_v1, %v1900_v21 }
 0x2c3   : > { %v1956_v58 = vadd.f32 %v1901_v50, %v4470_v38 }
 0x2c5   : > { %v1988_v19 = vmax.f32 %v1956_v58, 0.0 }
 0x2c7   : > { %2020 = vst.msk [vmem:[%s4094_s30 + $0xa0] sm:$0xff] %vm877_vm2, %v1988_v19 }
 0x2c8   : > { %v1903_v57 = vpop.f32.mrf.mxu1 }
 0x2c9   : > { %v1904_v15 = vadd.f32 %v4085_v1, %v1903_v57 }
 0x2cb   : > { %v1957_v54 = vadd.f32 %v1904_v15, %v4472_v0 }
 0x2cd   : > { %v1989_v60 = vmax.f32 %v1957_v54, 0.0 }
 0x2cf   : > { %2021 = vst.msk [vmem:[%s4094_s30 + $0xa8] sm:$0xff] %vm877_vm2, %v1989_v60 }
 0x2d0   : > { %v1906_v40 = vpop.f32.mrf.mxu1 }
 0x2d1   : > { %v1907_v59 = vadd.f32 %v4085_v1, %v1906_v40 }
 0x2d3   : > { %v1958_v44 = vadd.f32 %v1907_v59, %v4473_v13 }
 0x2d5   : > { %v1990_v37 = vmax.f32 %v1958_v44, 0.0 }
 0x2d7   : > { %2022 = vst.msk [vmem:[%s4094_s30 + $0xb0] sm:$0xff] %vm877_vm2, %v1990_v37 }
 0x2d8   : > { %v1909_v38 = vpop.f32.mrf.mxu1 }
 0x2d9   : > { %v1910_v62 = vadd.f32 %v4085_v1, %v1909_v38 }
 0x2db   : > { %v1959_v45 = vadd.f32 %v1910_v62, %v4474_v3 }
 0x2dd   : > { %v1991_v35 = vmax.f32 %v1959_v45, 0.0 }
 0x2df   : > { %2023 = vst.msk [vmem:[%s4094_s30 + $0xb8] sm:$0xff] %vm877_vm2, %v1991_v35 }
 0x2e0   : > { %v1912_v0 = vpop.f32.mrf.mxu1 }
 0x2e1   : > { %v1913_v9 = vadd.f32 %v4085_v1, %v1912_v0 }
 0x2e3   : > { %v1960_v17 = vadd.f32 %v1913_v9, %v4475_v28 }
 0x2e5   : > { %v1992_v32 = vmax.f32 %v1960_v17, 0.0 }
 0x2e7   : > { %2024 = vst.msk [vmem:[%s4094_s30 + $0xc0] sm:$0xff] %vm877_vm2, %v1992_v32 }
 0x2e8   : > { %v1915_v13 = vpop.f32.mrf.mxu1 }
 0x2e9   : > { %v1916_v34 = vadd.f32 %v4085_v1, %v1915_v13 }
 0x2eb   : > { %v1961_v61 = vadd.f32 %v1916_v34, %v4478_v16 }
 0x2ed   : > { %v1993_v4 = vmax.f32 %v1961_v61, 0.0 }
 0x2ef   : > { %2025 = vst.msk [vmem:[%s4094_s30 + $0xc8] sm:$0xff] %vm877_vm2, %v1993_v4 }
 0x2f0   : > { %v1918_v3 = vpop.f32.mrf.mxu1 }
 0x2f1   : > { %v1919_v31 = vadd.f32 %v4085_v1, %v1918_v3 }
 0x2f3   : > { %v1962_v51 = vadd.f32 %v1919_v31, %v4481_v25 }
 0x2f5   : > { %v1994_v30 = vmax.f32 %v1962_v51, 0.0 }
 0x2f7   : > { %2026 = vst.msk [vmem:[%s4094_s30 + $0xd0] sm:$0xff] %vm877_vm2, %v1994_v30 }
 0x2f8   : > { %v1921_v28 = vpop.f32.mrf.mxu1 }
 0x2f9   : > { %v1922_v8 = vadd.f32 %v4085_v1, %v1921_v28 }
 0x2fb   : > { %v1963_v5 = vadd.f32 %v1922_v8, %v4484_v11 }
 0x2fd   : > { %v1995_v16 = vmax.f32 %v1963_v5, 0.0 }
 0x2ff   : > { %2027 = vst.msk [vmem:[%s4094_s30 + $0xd8] sm:$0xff] %vm877_vm2, %v1995_v16 }
 0x300   : > { %v1924_v48 = vpop.f32.mrf.mxu1 }
 0x301   : > { %v1925_v22 = vadd.f32 %v4085_v1, %v1924_v48 }
 0x303   : > { %v1964_v7 = vadd.f32 %v1925_v22, %v4486_v10 }
 0x305   : > { %v1996_v25 = vmax.f32 %v1964_v7, 0.0 }
 0x307   : > { %2028 = vst.msk [vmem:[%s4094_s30 + $0xe0] sm:$0xff] %vm877_vm2, %v1996_v25 }
 0x308   : > { %v1927_v43 = vpop.f32.mrf.mxu1 }
 0x309   : > { %v1928_v27 = vadd.f32 %v4085_v1, %v1927_v43 }
 0x30b   : > { %v1965_v53 = vadd.f32 %v1928_v27, %v4487_v63 }
 0x30d   : > { %v1997_v11 = vmax.f32 %v1965_v53, 0.0 }
 0x30f   : > { %2029 = vst.msk [vmem:[%s4094_s30 + $0xe8] sm:$0xff] %vm877_vm2, %v1997_v11 }
 0x310   : > { %v1930_v24 = vpop.f32.mrf.mxu1 }
 0x311   : > { %v1931_v36 = vadd.f32 %v4085_v1, %v1930_v24 }
 0x313   : > { %v1966_v6 = vadd.f32 %v1931_v36, %v3888_v14 }
 0x315   : > { %v1998_v10 = vmax.f32 %v1966_v6, 0.0 }
 0x317   : > { %2030 = vst.msk [vmem:[%s4094_s30 + $0xf0] sm:$0xff] %vm877_vm2, %v1998_v10 }
 0x318   : > { %v1933_v63 = vpop.f32.mrf.mxu1 }
 0x319   : > { %v1934_v49 = vadd.f32 %v4085_v1, %v1933_v63 }
 0x31b   : > { %v1967_v29 = vadd.f32 %v1934_v49, %v3835_v23 }
 0x31d   : > { %v1999_v47 = vmax.f32 %v1967_v29, 0.0 }
 0x31f   : > { %2031 = vst.msk [vmem:[%s4094_s30 + $0xf8] sm:$0xff] %vm877_vm2, %v1999_v47 }
 0x320   : > { %2446 = shalt.err (!%p2443_p3)
}
 0x321   : > { %s2484_s25 = smov 128   ;;  %s2485_s26 = smov 8  }
 0x322   : > { %2219 = dma.vmem_to_hbm [thread:$0]  (%p2554_p5), %s2046_s12, 4096, %s2048_s13, %s2033_s22, %s2484_s25, %s2484_s25, %s2485_s26  }
 0x323 PF: > { %p2225_p4 = scmp.ge.s32.totalorder %s2481_s21, 2  ;;  %s2062_s30 = sand.u32 1, %s2469_s18  }
 0x324   : > { %s2063_s6 = scalar_lea.sflag [#allocation3], %s2062_s30 }
 0x325   : > { %p2222_p7 = pnand %p2225_p4, %p2558_p6 }
 0x327   : > { %p2223_p8 = pneg %p2222_p7 }
 0x329   : > { %2464 = dma.done.wait (%p2223_p8), %s2063_s6, 4096  }
 0x32a   : > { %2466 = vsyncadd (%p2223_p8), %s2063_s6, 4294963200  ;;  %p15_p9 = scmp.ge.s32.totalorder %s2541_s24, 4   ;;  %s4514_s18 = smov %s2473_s19 }
 0x32b   : > { %s4515_s19 = smov %s2477_s20  ;;  %s4516_s20 = smov %s2552_s27 }
 0x32c   : > { %s4517_s21 = smov %s2541_s24  ;;  %17 = sbr.rel (!%p15_p9) target bundleno = 3 (0x3), region = 75 }
 0x331   :  { %2069 = vsyncpa [#allocation3], 1 }
 0x332   :  { %2071 = vsyncpa [#allocation3 + $0x1], 1 }

</bundles_post_ra>
